<compile_context>
chip_gen: v5e
topology: v5e:2x2
jax: 0.10.0
libtpu: 0.0.40
codegen_flags: <defaults>
</compile_context>

<pallas_src>
import math

import jax
import jax.numpy as jnp
from jax import lax
from jax.experimental import pallas as pl
from jax.experimental.pallas import tpu as pltpu

# ----------------------------- configuration ---------------------------------
B = 2
DIM = 64
H = 8
W = 8
N = H * W                    # tokens per image (64)
BD = B * DIM                 # batch-in-lanes slab width (128)
SCALES = 2
WIDTH = max(int(math.ceil(DIM / SCALES)), int(math.floor(DIM // SCALES)))  # 32
NUMS = 1 if SCALES == 1 else SCALES - 1                                    # 1
NUM_HEADS = 8
HEAD_DIM = DIM // NUM_HEADS  # 8
EXPAN = 4
HIDDEN = EXPAN * DIM         # 256
BH = B * HIDDEN              # 512
POS_HID = 32                 # PositionalEncodingFourier hidden_dim default
NORM_EPS = 1e-12             # F.normalize eps
BN_EPS = 1e-5                # nn.BatchNorm2d eps

# TODO(synk): scales > 2 (multi-stage Res2Net depthwise-conv loop with running
#             accumulation) is not implemented in-kernel; scales=2 (nums=1) is used,
#             which matches the loop with a single conv stage.
# TODO(synk): BatchNorm is implemented in inference mode (running stats folded into
#             per-channel scale/shift); training-mode batch statistics are not computed.
# TODO(synk): on v7x the single grid step leaves one TensorCore idle; a batch-split
#             grid (token-major layout) would use both TCs but is not enabled here
#             because it is a regression on v5e/v6e (1 TC).


# ----------------------- positional encoding features ------------------------
def fourier_pos_features(Hh, Ww, hidden_dim=POS_HID, temperature=10000.0):
    """Batch-independent Fourier features (N, 2*hidden_dim), matching
    PositionalEncodingFourier before the 1x1 projection (projection done in wrapper)."""
    scale = 2.0 * math.pi
    eps = 1e-6
    y_embed = (jnp.arange(1, Hh + 1, dtype=jnp.float32) / (Hh + eps)) * scale
    x_embed = (jnp.arange(1, Ww + 1, dtype=jnp.float32) / (Ww + eps)) * scale
    y_embed = jnp.broadcast_to(y_embed[:, None], (Hh, Ww))
    x_embed = jnp.broadcast_to(x_embed[None, :], (Hh, Ww))
    i = jnp.arange(hidden_dim, dtype=jnp.float32)
    dim_t = temperature ** (2.0 * jnp.floor(i / 2.0) / hidden_dim)

    def enc(e):
        p = e[:, :, None] / dim_t                                   # (H, W, hid)
        s = jnp.sin(p[..., 0::2])
        c = jnp.cos(p[..., 1::2])
        return jnp.stack([s, c], axis=-1).reshape(Hh, Ww, hidden_dim)

    pos = jnp.concatenate([enc(y_embed), enc(x_embed)], axis=-1)    # (H, W, 2*hid)
    return pos.reshape(Hh * Ww, 2 * hidden_dim).astype(jnp.float32)


# --------------------------------- kernel ------------------------------------
def _sdta_kernel(patches_ref, dww_ref, base_ref, xres_ref,
                 qkvw_ref, qkvb_ref, qkscale_ref, mask_ref,
                 projw_ref, projb_ref,
                 pw1w_ref, pw1b_ref, pw2w_ref, pw2b_ref,
                 out_ref):
    f32 = jnp.float32
    bf16 = jnp.bfloat16

    # ---- 3x3 depthwise conv (bn1 folded into weights; lanes >= WIDTH are zeroed) ----
    acc = patches_ref[0] * dww_ref[0]
    for tap in range(1, 9):
        acc = acc + patches_ref[tap] * dww_ref[tap]
    # base = conv-bias+BN-shift+pos on conv lanes, BN(x)+pos on passthrough lanes
    t = acc + base_ref[...]                                           # (N, BD) f32

    # ---- fused per-batch qkv projection (block-diag over batch, bf16 MXU, f32 acc) ----
    qkv = jnp.dot(t.astype(bf16), qkvw_ref[...],
                  preferred_element_type=f32) + qkvb_ref[...]         # (N, 3*BD)
    q = qkv[:, 0 * BD:1 * BD]
    k = qkv[:, 1 * BD:2 * BD]
    v = qkv[:, 2 * BD:3 * BD]

    # ---- per-(batch, channel) L2 norm over tokens; per-head temperature folded into q ----
    qss = jnp.sum(q * q, axis=0, keepdims=True)                       # (1, BD)
    kss = jnp.sum(k * k, axis=0, keepdims=True)
    qn = q * (lax.rsqrt(jnp.maximum(qss, NORM_EPS * NORM_EPS)) * qkscale_ref[...])
    kn = k * lax.rsqrt(jnp.maximum(kss, NORM_EPS * NORM_EPS))

    # ---- block-diagonal (batch x head) XCA in one 128-lane pass ----
    # scoresT[j, i] = sum_n kn[n, j] * qn[n, i]  (== scores[i, j]); contraction over the
    # token axis expressed directly in dot_general (no materialized transpose of qn).
    scoresT = lax.dot_general(kn.astype(bf16), qn.astype(bf16),
                              (((0,), (0,)), ((), ())),
                              preferred_element_type=f32)             # (BD, BD)
    # q/k are L2-normalized so |score| <= temperature: no row-max subtraction needed.
    # Multiplicative 0/1 block mask after exp keeps off-(batch,head) entries exactly zero.
    e = jnp.exp(scoresT) * mask_ref[...]                              # f32
    denom = jnp.sum(e, axis=0, keepdims=True)                         # (1, BD)
    av = jnp.dot(v.astype(bf16), e.astype(bf16),
                 preferred_element_type=f32)                          # (N, BD)
    xca = av * pl.reciprocal(denom, approx=True)

    # ---- output projection (gamma_xca folded) + residual on the normed+pos stream ----
    t = t + jnp.dot(xca.astype(bf16), projw_ref[...],
                    preferred_element_type=f32) + projb_ref[...]

    # ---- inverted-bottleneck MLP: BN2 folded into pwconv1, gamma into pwconv2 ----
    h1 = jnp.dot(t.astype(bf16), pw1w_ref[...],
                 preferred_element_type=f32) + pw1b_ref[...]          # (N, BH)
    h1 = h1 * jnp.clip(h1 + 3.0, 0.0, 6.0) * (1.0 / 6.0)              # Hardswish (f32)
    h2 = jnp.dot(h1.astype(bf16), pw2w_ref[...],
                 preferred_element_type=f32) + pw2b_ref[...]          # (N, BD)

    out_ref[...] = xres_ref[...] + h2                                 # residual from ORIGINAL input


# -------------------------------- wrapper -------------------------------------
def _fold_params(p):
    """Wrapper-side algebra: hoist pos projection, fold BN / layer-scale into weights,
    build batch-block-diagonal bf16 weights for the batch-in-lanes slab layout."""
    f32, bf16 = jnp.float32, jnp.bfloat16
    f = {}

    def blockdiag(w):          # (cin, cout) -> (B*cin, B*cout)
        return jnp.kron(jnp.eye(B, dtype=f32), w.astype(f32))

    bn1_s = p['bn1_s'][0]      # (DIM,)
    bn1_b = p['bn1_b'][0]

    # depthwise conv weights: bn1 folded, zero-padded to DIM lanes, tiled per batch lane-block
    dww = p['dw_w'] * bn1_s[:WIDTH]                                   # (9, WIDTH)
    dww = jnp.pad(dww, ((0, 0), (0, DIM - WIDTH)))                    # (9, DIM)
    f['dw_w'] = jnp.tile(dww, (1, B)).reshape(9, 1, BD).astype(f32)   # (9, 1, BD)

    # per-channel scale/shift used by the wrapper to build the `base` slab:
    #   lanes < WIDTH  : conv bias (bn1-folded), no x passthrough (conv supplies the value)
    #   lanes >= WIDTH : inference-mode BN scale/shift on the untouched channels
    lane = jnp.arange(DIM)
    f['chan_scale'] = jnp.where(lane < WIDTH, 0.0, bn1_s).reshape(1, DIM).astype(f32)
    conv_bias = jnp.pad(p['dw_b'][0] * bn1_s[:WIDTH], (0, DIM - WIDTH))
    f['chan_shift'] = (conv_bias + bn1_b).reshape(1, DIM).astype(f32)

    # positional encoding projection (input independent) hoisted out of the kernel
    f['pos'] = (fourier_pos_features(H, W) @ p['pos_w'] + p['pos_b']).astype(f32)  # (N, DIM)

    # fused qkv: block-diagonal over batch; output lanes ordered [q-slab | k-slab | v-slab]
    qkv_wT = p['qkv_w'].T.astype(f32)                                 # (DIM, 3*DIM), cols [q|k|v]
    f['qkv_w'] = jnp.concatenate(
        [blockdiag(qkv_wT[:, kind * DIM:(kind + 1) * DIM]) for kind in range(3)],
        axis=1).astype(bf16)                                          # (BD, 3*BD)
    qb = p['qkv_b'].reshape(3, DIM)
    f['qkv_b'] = jnp.concatenate([jnp.tile(qb[kind], B) for kind in range(3)]
                                 ).reshape(1, 3 * BD).astype(f32)

    # per-head temperature applied as per-lane scale on the normalized q slab
    temp_chan = jnp.repeat(p['temp'], HEAD_DIM)                       # (DIM,)
    f['qk_scale'] = jnp.tile(temp_chan, B).reshape(1, BD).astype(f32)

    # 0/1 block-diagonal (batch x head) attention mask (8-lane groups), kept in f32
    grp = jnp.arange(BD) // HEAD_DIM
    f['mask'] = (grp[:, None] == grp[None, :]).astype(f32)            # (BD, BD)

    # output projection with gamma_xca folded, block-diagonal over batch
    f['proj_w'] = blockdiag(p['proj_w'] * p['gamma_xca']).astype(bf16)          # (BD, BD)
    f['proj_b'] = jnp.tile((p['proj_b'] * p['gamma_xca'])[0], B).reshape(1, BD).astype(f32)

    # MLP: BN2 folded into pwconv1, gamma folded into pwconv2, block-diagonal over batch
    pw1_w = p['bn2_s'].reshape(DIM, 1) * p['pw1_w']                   # (DIM, HIDDEN)
    pw1_b = p['bn2_b'] @ p['pw1_w'] + p['pw1_b']                      # (1, HIDDEN)
    f['pw1_w'] = blockdiag(pw1_w).astype(bf16)                        # (BD, BH)
    f['pw1_b'] = jnp.tile(pw1_b[0], B).reshape(1, BH).astype(f32)
    pw2_w = p['pw2_w'] * p['gamma']                                   # (HIDDEN, DIM)
    pw2_b = p['pw2_b'] * p['gamma']
    f['pw2_w'] = blockdiag(pw2_w).astype(bf16)                        # (BH, BD)
    f['pw2_b'] = jnp.tile(pw2_b[0], B).reshape(1, BD).astype(f32)
    return f


def sdta_forward(x_nchw, p):
    # PyTorch NCHW at the boundary; kernel runs on a batch-in-lanes (N, B*C) slab.
    assert x_nchw.shape == (B, DIM, H, W)
    f32 = jnp.float32
    f = _fold_params(p)

    x_nhwc = jnp.transpose(x_nchw, (0, 2, 3, 1)).astype(f32)          # (B, H, W, C)
    x_bnc = x_nhwc.reshape(B, N, DIM)

    def to_slab(a_bnc):        # (B, N, C') -> (N, B*C'): batch concatenated along lanes
        return jnp.transpose(a_bnc, (1, 0, 2)).reshape(N, B * a_bnc.shape[-1])

    xres = to_slab(x_bnc)                                             # (N, BD) original tokens
    base = to_slab(x_bnc * f['chan_scale'] + f['chan_shift'] + f['pos'][None])

    # 3x3 depthwise-conv patches: 9 pre-shifted, lane-aligned slabs (zeros in lanes >= WIDTH)
    xpad = jnp.pad(x_nhwc[..., :WIDTH], ((0, 0), (1, 1), (1, 1), (0, 0)))
    taps = []
    for dy in range(3):
        for dx in range(3):
            s = xpad[:, dy:dy + H, dx:dx + W, :].reshape(B, N, WIDTH)
            s = jnp.pad(s, ((0, 0), (0, 0), (0, DIM - WIDTH)))
            taps.append(to_slab(s))
    patches = jnp.stack(taps, axis=0).astype(f32)                     # (9, N, BD)

    def vspec(shape):
        nd = len(shape)
        return pl.BlockSpec(shape, lambda i, _nd=nd: (0,) * _nd)

    inputs = [patches, f['dw_w'], base, xres,
              f['qkv_w'], f['qkv_b'], f['qk_scale'], f['mask'],
              f['proj_w'], f['proj_b'],
              f['pw1_w'], f['pw1_b'], f['pw2_w'], f['pw2_b']]
    in_specs = [vspec(a.shape) for a in inputs]

    out_slab = pl.pallas_call(
        _sdta_kernel,
        out_shape=jax.ShapeDtypeStruct((N, BD), f32),
        grid_spec=pltpu.PrefetchScalarGridSpec(
            num_scalar_prefetch=0,
            grid=(1,),                               # single fused step over the whole batch
            in_specs=in_specs,
            out_specs=vspec((N, BD)),
        ),
        compiler_params=pltpu.CompilerParams(dimension_semantics=("arbitrary",)),
    )(*inputs)

    out_bnc = jnp.transpose(out_slab.reshape(N, B, DIM), (1, 0, 2))   # (B, N, C)
    return jnp.transpose(out_bnc.reshape(B, H, W, DIM), (0, 3, 1, 2))


# -------------------------- deterministic parameters --------------------------
def init_params(key):
    ks = jax.random.split(key, 24)
    f32 = jnp.float32

    def nrm(k, shape, s):
        return (s * jax.random.normal(k, shape)).astype(f32)

    def bn_fold(kw, kb, km, kv, c):
        wgt = 1.0 + 0.1 * jax.random.normal(kw, (c,))
        bias = 0.1 * jax.random.normal(kb, (c,))
        mean = 0.05 * jax.random.normal(km, (c,))
        var = 1.0 + 0.1 * jnp.abs(jax.random.normal(kv, (c,)))
        s = wgt / jnp.sqrt(var + BN_EPS)
        return s.reshape(1, c).astype(f32), (bias - mean * s).reshape(1, c).astype(f32)

    p = {}
    p['dw_w'] = nrm(ks[0], (9, WIDTH), 0.1)          # Conv2d(width, width, 3, groups=width)
    p['dw_b'] = nrm(ks[1], (1, WIDTH), 0.05)
    p['bn1_s'], p['bn1_b'] = bn_fold(ks[2], ks[3], ks[4], ks[5], DIM)       # norm_xca
    p['pos_w'] = nrm(ks[6], (2 * POS_HID, DIM), 0.05)                       # token_projection (in,out)
    p['pos_b'] = nrm(ks[7], (1, DIM), 0.02)
    p['qkv_w'] = nrm(ks[8], (3 * DIM, DIM), 0.05)                           # (out=3C, in=C), rows = [q|k|v]
    p['qkv_b'] = nrm(ks[9], (3 * DIM, 1), 0.02)
    p['temp'] = (1.0 + 0.05 * jax.random.normal(ks[10], (NUM_HEADS,))).astype(f32)
    p['proj_w'] = nrm(ks[11], (DIM, DIM), 0.05)                             # (in, out)
    p['proj_b'] = nrm(ks[12], (1, DIM), 0.02)
    p['bn2_s'], p['bn2_b'] = bn_fold(ks[13], ks[14], ks[15], ks[16], DIM)   # norm
    p['pw1_w'] = nrm(ks[17], (DIM, HIDDEN), 0.05)
    p['pw1_b'] = nrm(ks[18], (1, HIDDEN), 0.02)
    p['pw2_w'] = nrm(ks[19], (HIDDEN, DIM), 0.05)
    p['pw2_b'] = nrm(ks[20], (1, DIM), 0.02)
    # layer-scale params (module inits to 1e-6*ones; non-trivial deterministic values used
    # here so the attention / MLP branches are numerically visible in the test).
    p['gamma_xca'] = (0.5 + 0.05 * jax.random.normal(ks[21], (1, DIM))).astype(f32)
    p['gamma'] = (0.5 + 0.05 * jax.random.normal(ks[22], (1, DIM))).astype(f32)
    return p


# ------------------------------ pure-JAX reference -----------------------------
def reference_forward(x_nchw, p):
    x = jnp.transpose(x_nchw, (0, 2, 3, 1)).astype(jnp.float32)      # NHWC
    xpad = jnp.pad(x, ((0, 0), (1, 1), (1, 1), (0, 0)))
    conv = jnp.zeros((B, H, W, WIDTH), jnp.float32)
    wconv = p['dw_w'].reshape(3, 3, WIDTH)
    for dy in range(3):
        for dx in range(3):
            conv = conv + xpad[:, dy:dy + H, dx:dx + W, :WIDTH] * wconv[dy, dx]
    conv = conv + p['dw_b']
    y = jnp.concatenate([conv, x[..., WIDTH:]], axis=-1)
    y = y * p['bn1_s'] + p['bn1_b']
    t = y.reshape(B, N, DIM)
    pos = fourier_pos_features(H, W) @ p['pos_w'] + p['pos_b']
    t = t + pos[None]
    qkv = t @ p['qkv_w'].T + p['qkv_b'].reshape(-1)
    qkv = qkv.reshape(B, N, 3, NUM_HEADS, HEAD_DIM)
    q = jnp.transpose(qkv[:, :, 0], (0, 2, 3, 1))                    # (B, heads, d, N)
    k = jnp.transpose(qkv[:, :, 1], (0, 2, 3, 1))
    v = jnp.transpose(qkv[:, :, 2], (0, 2, 3, 1))
    qn = q / jnp.maximum(jnp.sqrt(jnp.sum(q * q, -1, keepdims=True)), NORM_EPS)
    kn = k / jnp.maximum(jnp.sqrt(jnp.sum(k * k, -1, keepdims=True)), NORM_EPS)
    attn = jnp.einsum('bhcn,bhdn->bhcd', qn, kn) * p['temp'].reshape(1, NUM_HEADS, 1, 1)
    attn = jax.nn.softmax(attn, axis=-1)
    xo = jnp.einsum('bhcd,bhdn->bhcn', attn, v)
    xo = jnp.transpose(xo, (0, 3, 1, 2)).reshape(B, N, DIM)
    xo = xo @ p['proj_w'] + p['proj_b']
    t = t + p['gamma_xca'] * xo
    tn = t * p['bn2_s'] + p['bn2_b']
    h1 = tn @ p['pw1_w'] + p['pw1_b']
    h1 = h1 * jnp.clip(h1 + 3.0, 0.0, 6.0) / 6.0
    h2 = h1 @ p['pw2_w'] + p['pw2_b']
    h2 = p['gamma'] * h2
    out = x.reshape(B, N, DIM) + h2
    return jnp.transpose(out.reshape(B, H, W, DIM), (0, 3, 1, 2))


# ----------------------------------- main --------------------------------------
if __name__ == "__main__":
    key = jax.random.PRNGKey(0)
    kx, kp = jax.random.split(key)
    x = jax.random.normal(kx, (B, DIM, H, W), dtype=jnp.float32)     # NCHW, like PyTorch
    params = init_params(kp)

    out = sdta_forward(x, params)
    out = jax.block_until_ready(out)
    assert out.shape == (B, DIM, H, W)

    ref = reference_forward(x, params)
    max_err = float(jnp.max(jnp.abs(out - ref)))
    if not bool(jnp.allclose(out, ref, atol=5e-3, rtol=5e-3)):
        raise SystemExit(f"Mismatch vs JAX reference (max abs err = {max_err})")
    print("KERNEL_OK")
</pallas_src>

<mosaic_0001>
module attributes {stable_mosaic.version = 11 : i64} {
  func.func @_sdta_kernel(%arg0: i32, %arg1: memref<9x64x128xf32, #tpu.memory_space<vmem>>, %arg2: memref<9x1x128xf32, #tpu.memory_space<vmem>>, %arg3: memref<64x128xf32, #tpu.memory_space<vmem>>, %arg4: memref<64x128xf32, #tpu.memory_space<vmem>>, %arg5: memref<128x384xbf16, #tpu.memory_space<vmem>>, %arg6: memref<1x384xf32, #tpu.memory_space<vmem>>, %arg7: memref<1x128xf32, #tpu.memory_space<vmem>>, %arg8: memref<128x128xf32, #tpu.memory_space<vmem>>, %arg9: memref<128x128xbf16, #tpu.memory_space<vmem>>, %arg10: memref<1x128xf32, #tpu.memory_space<vmem>>, %arg11: memref<128x512xbf16, #tpu.memory_space<vmem>>, %arg12: memref<1x512xf32, #tpu.memory_space<vmem>>, %arg13: memref<512x128xbf16, #tpu.memory_space<vmem>>, %arg14: memref<1x128xf32, #tpu.memory_space<vmem>>, %arg15: memref<64x128xf32, #tpu.memory_space<vmem>>) attributes {dimension_semantics = [#tpu.dimension_semantics<arbitrary>], iteration_bounds = array<i64: 1>, scalar_prefetch = 0 : i64, scratch_operands = 0 : i64, tpu.core_type = #tpu.core_type<tc>, window_params = [{pipeline_mode = #tpu.pipeline_mode<synchronous>, transform_indices = @transform_0, window_bounds = array<i64: 9, 64, 128>}, {pipeline_mode = #tpu.pipeline_mode<synchronous>, transform_indices = @transform_1, window_bounds = array<i64: 9, 1, 128>}, {pipeline_mode = #tpu.pipeline_mode<synchronous>, transform_indices = @transform_2, window_bounds = array<i64: 64, 128>}, {pipeline_mode = #tpu.pipeline_mode<synchronous>, transform_indices = @transform_3, window_bounds = array<i64: 64, 128>}, {pipeline_mode = #tpu.pipeline_mode<synchronous>, transform_indices = @transform_4, window_bounds = array<i64: 128, 384>}, {pipeline_mode = #tpu.pipeline_mode<synchronous>, transform_indices = @transform_5, window_bounds = array<i64: 1, 384>}, {pipeline_mode = #tpu.pipeline_mode<synchronous>, transform_indices = @transform_6, window_bounds = array<i64: 1, 128>}, {pipeline_mode = #tpu.pipeline_mode<synchronous>, transform_indices = @transform_7, window_bounds = array<i64: 128, 128>}, {pipeline_mode = #tpu.pipeline_mode<synchronous>, transform_indices = @transform_8, window_bounds = array<i64: 128, 128>}, {pipeline_mode = #tpu.pipeline_mode<synchronous>, transform_indices = @transform_9, window_bounds = array<i64: 1, 128>}, {pipeline_mode = #tpu.pipeline_mode<synchronous>, transform_indices = @transform_10, window_bounds = array<i64: 128, 512>}, {pipeline_mode = #tpu.pipeline_mode<synchronous>, transform_indices = @transform_11, window_bounds = array<i64: 1, 512>}, {pipeline_mode = #tpu.pipeline_mode<synchronous>, transform_indices = @transform_12, window_bounds = array<i64: 512, 128>}, {pipeline_mode = #tpu.pipeline_mode<synchronous>, transform_indices = @transform_13, window_bounds = array<i64: 1, 128>}, {pipeline_mode = #tpu.pipeline_mode<synchronous>, transform_indices = @transform_14, window_bounds = array<i64: 64, 128>}]} {
    %c0 = arith.constant 0 : index
    %c0_0 = arith.constant 0 : index
    %c0_1 = arith.constant 0 : index
    %0 = vector.load %arg1[%c0, %c0_0, %c0_1] : memref<9x64x128xf32, #tpu.memory_space<vmem>>, vector<1x64x128xf32>
    %1 = vector.shape_cast %0 : vector<1x64x128xf32> to vector<64x128xf32>
    %c0_2 = arith.constant 0 : index
    %c0_3 = arith.constant 0 : index
    %c0_4 = arith.constant 0 : index
    %2 = vector.load %arg2[%c0_2, %c0_3, %c0_4] : memref<9x1x128xf32, #tpu.memory_space<vmem>>, vector<1x1x128xf32>
    %3 = vector.shape_cast %2 : vector<1x1x128xf32> to vector<1x128xf32>
    %4 = vector.broadcast %3 : vector<1x128xf32> to vector<64x128xf32>
    %5 = arith.mulf %1, %4 : vector<64x128xf32>
    %c1 = arith.constant 1 : index
    %c0_5 = arith.constant 0 : index
    %c0_6 = arith.constant 0 : index
    %6 = vector.load %arg1[%c1, %c0_5, %c0_6] : memref<9x64x128xf32, #tpu.memory_space<vmem>>, vector<1x64x128xf32>
    %7 = vector.shape_cast %6 : vector<1x64x128xf32> to vector<64x128xf32>
    %c1_7 = arith.constant 1 : index
    %c0_8 = arith.constant 0 : index
    %c0_9 = arith.constant 0 : index
    %8 = vector.load %arg2[%c1_7, %c0_8, %c0_9] : memref<9x1x128xf32, #tpu.memory_space<vmem>>, vector<1x1x128xf32>
    %9 = vector.shape_cast %8 : vector<1x1x128xf32> to vector<1x128xf32>
    %10 = vector.broadcast %9 : vector<1x128xf32> to vector<64x128xf32>
    %11 = arith.mulf %7, %10 : vector<64x128xf32>
    %12 = arith.addf %5, %11 : vector<64x128xf32>
    %c2 = arith.constant 2 : index
    %c0_10 = arith.constant 0 : index
    %c0_11 = arith.constant 0 : index
    %13 = vector.load %arg1[%c2, %c0_10, %c0_11] : memref<9x64x128xf32, #tpu.memory_space<vmem>>, vector<1x64x128xf32>
    %14 = vector.shape_cast %13 : vector<1x64x128xf32> to vector<64x128xf32>
    %c2_12 = arith.constant 2 : index
    %c0_13 = arith.constant 0 : index
    %c0_14 = arith.constant 0 : index
    %15 = vector.load %arg2[%c2_12, %c0_13, %c0_14] : memref<9x1x128xf32, #tpu.memory_space<vmem>>, vector<1x1x128xf32>
    %16 = vector.shape_cast %15 : vector<1x1x128xf32> to vector<1x128xf32>
    %17 = vector.broadcast %16 : vector<1x128xf32> to vector<64x128xf32>
    %18 = arith.mulf %14, %17 : vector<64x128xf32>
    %19 = arith.addf %12, %18 : vector<64x128xf32>
    %c3 = arith.constant 3 : index
    %c0_15 = arith.constant 0 : index
    %c0_16 = arith.constant 0 : index
    %20 = vector.load %arg1[%c3, %c0_15, %c0_16] : memref<9x64x128xf32, #tpu.memory_space<vmem>>, vector<1x64x128xf32>
    %21 = vector.shape_cast %20 : vector<1x64x128xf32> to vector<64x128xf32>
    %c3_17 = arith.constant 3 : index
    %c0_18 = arith.constant 0 : index
    %c0_19 = arith.constant 0 : index
    %22 = vector.load %arg2[%c3_17, %c0_18, %c0_19] : memref<9x1x128xf32, #tpu.memory_space<vmem>>, vector<1x1x128xf32>
    %23 = vector.shape_cast %22 : vector<1x1x128xf32> to vector<1x128xf32>
    %24 = vector.broadcast %23 : vector<1x128xf32> to vector<64x128xf32>
    %25 = arith.mulf %21, %24 : vector<64x128xf32>
    %26 = arith.addf %19, %25 : vector<64x128xf32>
    %c4 = arith.constant 4 : index
    %c0_20 = arith.constant 0 : index
    %c0_21 = arith.constant 0 : index
    %27 = vector.load %arg1[%c4, %c0_20, %c0_21] : memref<9x64x128xf32, #tpu.memory_space<vmem>>, vector<1x64x128xf32>
    %28 = vector.shape_cast %27 : vector<1x64x128xf32> to vector<64x128xf32>
    %c4_22 = arith.constant 4 : index
    %c0_23 = arith.constant 0 : index
    %c0_24 = arith.constant 0 : index
    %29 = vector.load %arg2[%c4_22, %c0_23, %c0_24] : memref<9x1x128xf32, #tpu.memory_space<vmem>>, vector<1x1x128xf32>
    %30 = vector.shape_cast %29 : vector<1x1x128xf32> to vector<1x128xf32>
    %31 = vector.broadcast %30 : vector<1x128xf32> to vector<64x128xf32>
    %32 = arith.mulf %28, %31 : vector<64x128xf32>
    %33 = arith.addf %26, %32 : vector<64x128xf32>
    %c5 = arith.constant 5 : index
    %c0_25 = arith.constant 0 : index
    %c0_26 = arith.constant 0 : index
    %34 = vector.load %arg1[%c5, %c0_25, %c0_26] : memref<9x64x128xf32, #tpu.memory_space<vmem>>, vector<1x64x128xf32>
    %35 = vector.shape_cast %34 : vector<1x64x128xf32> to vector<64x128xf32>
    %c5_27 = arith.constant 5 : index
    %c0_28 = arith.constant 0 : index
    %c0_29 = arith.constant 0 : index
    %36 = vector.load %arg2[%c5_27, %c0_28, %c0_29] : memref<9x1x128xf32, #tpu.memory_space<vmem>>, vector<1x1x128xf32>
    %37 = vector.shape_cast %36 : vector<1x1x128xf32> to vector<1x128xf32>
    %38 = vector.broadcast %37 : vector<1x128xf32> to vector<64x128xf32>
    %39 = arith.mulf %35, %38 : vector<64x128xf32>
    %40 = arith.addf %33, %39 : vector<64x128xf32>
    %c6 = arith.constant 6 : index
    %c0_30 = arith.constant 0 : index
    %c0_31 = arith.constant 0 : index
    %41 = vector.load %arg1[%c6, %c0_30, %c0_31] : memref<9x64x128xf32, #tpu.memory_space<vmem>>, vector<1x64x128xf32>
    %42 = vector.shape_cast %41 : vector<1x64x128xf32> to vector<64x128xf32>
    %c6_32 = arith.constant 6 : index
    %c0_33 = arith.constant 0 : index
    %c0_34 = arith.constant 0 : index
    %43 = vector.load %arg2[%c6_32, %c0_33, %c0_34] : memref<9x1x128xf32, #tpu.memory_space<vmem>>, vector<1x1x128xf32>
    %44 = vector.shape_cast %43 : vector<1x1x128xf32> to vector<1x128xf32>
    %45 = vector.broadcast %44 : vector<1x128xf32> to vector<64x128xf32>
    %46 = arith.mulf %42, %45 : vector<64x128xf32>
    %47 = arith.addf %40, %46 : vector<64x128xf32>
    %c7 = arith.constant 7 : index
    %c0_35 = arith.constant 0 : index
    %c0_36 = arith.constant 0 : index
    %48 = vector.load %arg1[%c7, %c0_35, %c0_36] : memref<9x64x128xf32, #tpu.memory_space<vmem>>, vector<1x64x128xf32>
    %49 = vector.shape_cast %48 : vector<1x64x128xf32> to vector<64x128xf32>
    %c7_37 = arith.constant 7 : index
    %c0_38 = arith.constant 0 : index
    %c0_39 = arith.constant 0 : index
    %50 = vector.load %arg2[%c7_37, %c0_38, %c0_39] : memref<9x1x128xf32, #tpu.memory_space<vmem>>, vector<1x1x128xf32>
    %51 = vector.shape_cast %50 : vector<1x1x128xf32> to vector<1x128xf32>
    %52 = vector.broadcast %51 : vector<1x128xf32> to vector<64x128xf32>
    %53 = arith.mulf %49, %52 : vector<64x128xf32>
    %54 = arith.addf %47, %53 : vector<64x128xf32>
    %c8 = arith.constant 8 : index
    %c0_40 = arith.constant 0 : index
    %c0_41 = arith.constant 0 : index
    %55 = vector.load %arg1[%c8, %c0_40, %c0_41] : memref<9x64x128xf32, #tpu.memory_space<vmem>>, vector<1x64x128xf32>
    %56 = vector.shape_cast %55 : vector<1x64x128xf32> to vector<64x128xf32>
    %c8_42 = arith.constant 8 : index
    %c0_43 = arith.constant 0 : index
    %c0_44 = arith.constant 0 : index
    %57 = vector.load %arg2[%c8_42, %c0_43, %c0_44] : memref<9x1x128xf32, #tpu.memory_space<vmem>>, vector<1x1x128xf32>
    %58 = vector.shape_cast %57 : vector<1x1x128xf32> to vector<1x128xf32>
    %59 = vector.broadcast %58 : vector<1x128xf32> to vector<64x128xf32>
    %60 = arith.mulf %56, %59 : vector<64x128xf32>
    %61 = arith.addf %54, %60 : vector<64x128xf32>
    %c0_45 = arith.constant 0 : index
    %c0_46 = arith.constant 0 : index
    %62 = vector.load %arg3[%c0_45, %c0_46] : memref<64x128xf32, #tpu.memory_space<vmem>>, vector<64x128xf32>
    %63 = arith.addf %61, %62 : vector<64x128xf32>
    %64 = arith.truncf %63 : vector<64x128xf32> to vector<64x128xbf16>
    %c0_47 = arith.constant 0 : index
    %c0_48 = arith.constant 0 : index
    %65 = vector.load %arg5[%c0_47, %c0_48] : memref<128x384xbf16, #tpu.memory_space<vmem>>, vector<128x384xbf16>
    %cst = arith.constant dense<0.000000e+00> : vector<64x384xf32>
    %66 = tpu.matmul %64, %65, %cst {dimension_numbers = #tpu.dot_dimension_numbers<[1], [0], [0], [1], [0, 0, 1, 1], [], []>} : vector<64x128xbf16>, vector<128x384xbf16>, vector<64x384xf32> -> vector<64x384xf32>
    %c0_49 = arith.constant 0 : index
    %c0_50 = arith.constant 0 : index
    %67 = vector.load %arg6[%c0_49, %c0_50] : memref<1x384xf32, #tpu.memory_space<vmem>>, vector<1x384xf32>
    %68 = vector.broadcast %67 : vector<1x384xf32> to vector<64x384xf32>
    %69 = arith.addf %66, %68 : vector<64x384xf32>
    %70 = vector.extract_strided_slice %69 {offsets = [0, 0], sizes = [64, 128], strides = [1, 1]} : vector<64x384xf32> to vector<64x128xf32>
    %71 = vector.extract_strided_slice %69 {offsets = [0, 128], sizes = [64, 128], strides = [1, 1]} : vector<64x384xf32> to vector<64x128xf32>
    %72 = vector.extract_strided_slice %69 {offsets = [0, 256], sizes = [64, 128], strides = [1, 1]} : vector<64x384xf32> to vector<64x128xf32>
    %73 = arith.mulf %70, %70 : vector<64x128xf32>
    %cst_51 = arith.constant dense<0.000000e+00> : vector<128xf32>
    %74 = vector.multi_reduction <add>, %73, %cst_51 [0] : vector<64x128xf32> to vector<128xf32>
    %75 = vector.shape_cast %74 : vector<128xf32> to vector<1x128xf32>
    %76 = arith.mulf %71, %71 : vector<64x128xf32>
    %cst_52 = arith.constant dense<0.000000e+00> : vector<128xf32>
    %77 = vector.multi_reduction <add>, %76, %cst_52 [0] : vector<64x128xf32> to vector<128xf32>
    %78 = vector.shape_cast %77 : vector<128xf32> to vector<1x128xf32>
    %cst_53 = arith.constant 1.000000e-24 : f32
    %79 = vector.broadcast %cst_53 : f32 to vector<1x128xf32>
    %80 = arith.maximumf %75, %79 : vector<1x128xf32>
    %81 = math.rsqrt %80 : vector<1x128xf32>
    %c0_54 = arith.constant 0 : index
    %c0_55 = arith.constant 0 : index
    %82 = vector.load %arg7[%c0_54, %c0_55] : memref<1x128xf32, #tpu.memory_space<vmem>>, vector<1x128xf32>
    %83 = arith.mulf %81, %82 : vector<1x128xf32>
    %84 = vector.broadcast %83 : vector<1x128xf32> to vector<64x128xf32>
    %85 = arith.mulf %70, %84 : vector<64x128xf32>
    %cst_56 = arith.constant 1.000000e-24 : f32
    %86 = vector.broadcast %cst_56 : f32 to vector<1x128xf32>
    %87 = arith.maximumf %78, %86 : vector<1x128xf32>
    %88 = math.rsqrt %87 : vector<1x128xf32>
    %89 = vector.broadcast %88 : vector<1x128xf32> to vector<64x128xf32>
    %90 = arith.mulf %71, %89 : vector<64x128xf32>
    %91 = arith.truncf %90 : vector<64x128xf32> to vector<64x128xbf16>
    %92 = arith.truncf %85 : vector<64x128xf32> to vector<64x128xbf16>
    %cst_57 = arith.constant dense<0.000000e+00> : vector<128x128xf32>
    %93 = tpu.matmul %91, %92, %cst_57 {dimension_numbers = #tpu.dot_dimension_numbers<[0], [0], [1], [1], [0, 1, 1, 1], [], []>} : vector<64x128xbf16>, vector<64x128xbf16>, vector<128x128xf32> -> vector<128x128xf32>
    %94 = math.exp %93 : vector<128x128xf32>
    %c0_58 = arith.constant 0 : index
    %c0_59 = arith.constant 0 : index
    %95 = vector.load %arg8[%c0_58, %c0_59] : memref<128x128xf32, #tpu.memory_space<vmem>>, vector<128x128xf32>
    %96 = arith.mulf %94, %95 : vector<128x128xf32>
    %cst_60 = arith.constant dense<0.000000e+00> : vector<128xf32>
    %97 = vector.multi_reduction <add>, %96, %cst_60 [0] : vector<128x128xf32> to vector<128xf32>
    %98 = vector.shape_cast %97 : vector<128xf32> to vector<1x128xf32>
    %99 = arith.truncf %72 : vector<64x128xf32> to vector<64x128xbf16>
    %100 = arith.truncf %96 : vector<128x128xf32> to vector<128x128xbf16>
    %cst_61 = arith.constant dense<0.000000e+00> : vector<64x128xf32>
    %101 = tpu.matmul %99, %100, %cst_61 {dimension_numbers = #tpu.dot_dimension_numbers<[1], [0], [0], [1], [0, 0, 1, 1], [], []>} : vector<64x128xbf16>, vector<128x128xbf16>, vector<64x128xf32> -> vector<64x128xf32>
    %102 = tpu.reciprocal %98 {approx = true} : vector<1x128xf32> -> vector<1x128xf32>
    %103 = vector.broadcast %102 : vector<1x128xf32> to vector<64x128xf32>
    %104 = arith.mulf %101, %103 : vector<64x128xf32>
    %105 = arith.truncf %104 : vector<64x128xf32> to vector<64x128xbf16>
    %c0_62 = arith.constant 0 : index
    %c0_63 = arith.constant 0 : index
    %106 = vector.load %arg9[%c0_62, %c0_63] : memref<128x128xbf16, #tpu.memory_space<vmem>>, vector<128x128xbf16>
    %cst_64 = arith.constant dense<0.000000e+00> : vector<64x128xf32>
    %107 = tpu.matmul %105, %106, %cst_64 {dimension_numbers = #tpu.dot_dimension_numbers<[1], [0], [0], [1], [0, 0, 1, 1], [], []>} : vector<64x128xbf16>, vector<128x128xbf16>, vector<64x128xf32> -> vector<64x128xf32>
    %108 = arith.addf %63, %107 : vector<64x128xf32>
    %c0_65 = arith.constant 0 : index
    %c0_66 = arith.constant 0 : index
    %109 = vector.load %arg10[%c0_65, %c0_66] : memref<1x128xf32, #tpu.memory_space<vmem>>, vector<1x128xf32>
    %110 = vector.broadcast %109 : vector<1x128xf32> to vector<64x128xf32>
    %111 = arith.addf %108, %110 : vector<64x128xf32>
    %112 = arith.truncf %111 : vector<64x128xf32> to vector<64x128xbf16>
    %c0_67 = arith.constant 0 : index
    %c0_68 = arith.constant 0 : index
    %113 = vector.load %arg11[%c0_67, %c0_68] : memref<128x512xbf16, #tpu.memory_space<vmem>>, vector<128x512xbf16>
    %cst_69 = arith.constant dense<0.000000e+00> : vector<64x512xf32>
    %114 = tpu.matmul %112, %113, %cst_69 {dimension_numbers = #tpu.dot_dimension_numbers<[1], [0], [0], [1], [0, 0, 1, 1], [], []>} : vector<64x128xbf16>, vector<128x512xbf16>, vector<64x512xf32> -> vector<64x512xf32>
    %c0_70 = arith.constant 0 : index
    %c0_71 = arith.constant 0 : index
    %115 = vector.load %arg12[%c0_70, %c0_71] : memref<1x512xf32, #tpu.memory_space<vmem>>, vector<1x512xf32>
    %116 = vector.broadcast %115 : vector<1x512xf32> to vector<64x512xf32>
    %117 = arith.addf %114, %116 : vector<64x512xf32>
    %cst_72 = arith.constant 3.000000e+00 : f32
    %118 = vector.broadcast %cst_72 : f32 to vector<64x512xf32>
    %119 = arith.addf %117, %118 : vector<64x512xf32>
    %cst_73 = arith.constant 0.000000e+00 : f32
    %cst_74 = arith.constant 6.000000e+00 : f32
    %120 = vector.broadcast %cst_73 : f32 to vector<64x512xf32>
    %121 = arith.maximumf %120, %119 : vector<64x512xf32>
    %122 = vector.broadcast %cst_74 : f32 to vector<64x512xf32>
    %123 = arith.minimumf %122, %121 : vector<64x512xf32>
    %124 = arith.mulf %117, %123 : vector<64x512xf32>
    %cst_75 = arith.constant 0.166666672 : f32
    %125 = vector.broadcast %cst_75 : f32 to vector<64x512xf32>
    %126 = arith.mulf %124, %125 : vector<64x512xf32>
    %127 = arith.truncf %126 : vector<64x512xf32> to vector<64x512xbf16>
    %c0_76 = arith.constant 0 : index
    %c0_77 = arith.constant 0 : index
    %128 = vector.load %arg13[%c0_76, %c0_77] : memref<512x128xbf16, #tpu.memory_space<vmem>>, vector<512x128xbf16>
    %cst_78 = arith.constant dense<0.000000e+00> : vector<64x128xf32>
    %129 = tpu.matmul %127, %128, %cst_78 {dimension_numbers = #tpu.dot_dimension_numbers<[1], [0], [0], [1], [0, 0, 1, 1], [], []>} : vector<64x512xbf16>, vector<512x128xbf16>, vector<64x128xf32> -> vector<64x128xf32>
    %c0_79 = arith.constant 0 : index
    %c0_80 = arith.constant 0 : index
    %130 = vector.load %arg14[%c0_79, %c0_80] : memref<1x128xf32, #tpu.memory_space<vmem>>, vector<1x128xf32>
    %131 = vector.broadcast %130 : vector<1x128xf32> to vector<64x128xf32>
    %132 = arith.addf %129, %131 : vector<64x128xf32>
    %c0_81 = arith.constant 0 : index
    %c0_82 = arith.constant 0 : index
    %133 = vector.load %arg4[%c0_81, %c0_82] : memref<64x128xf32, #tpu.memory_space<vmem>>, vector<64x128xf32>
    %134 = arith.addf %133, %132 : vector<64x128xf32>
    %c0_83 = arith.constant 0 : index
    %c0_84 = arith.constant 0 : index
    %135 = vector.load %arg15[%c0_83, %c0_84] : memref<64x128xf32, #tpu.memory_space<vmem>>, vector<64x128xf32>
    tpu.vector_store %arg15[%c0_83, %c0_84], %134 {strides = array<i32>} : memref<64x128xf32, #tpu.memory_space<vmem>>, vector<64x128xf32>,
    return
  }
  func.func @transform_0(%arg0: i32) -> (i32, i32, i32) {
    %c0_i32 = arith.constant 0 : i32
    %c0_i32_0 = arith.constant 0 : i32
    %c0_i32_1 = arith.constant 0 : i32
    %c0_i32_2 = arith.constant 0 : i32
    return %c0_i32, %c0_i32_0, %c0_i32_1 : i32, i32, i32
  }
  func.func @transform_1(%arg0: i32) -> (i32, i32, i32) {
    %c0_i32 = arith.constant 0 : i32
    %c0_i32_0 = arith.constant 0 : i32
    %c0_i32_1 = arith.constant 0 : i32
    %c0_i32_2 = arith.constant 0 : i32
    return %c0_i32, %c0_i32_0, %c0_i32_1 : i32, i32, i32
  }
  func.func @transform_2(%arg0: i32) -> (i32, i32) {
    %c0_i32 = arith.constant 0 : i32
    %c0_i32_0 = arith.constant 0 : i32
    %c0_i32_1 = arith.constant 0 : i32
    return %c0_i32, %c0_i32_0 : i32, i32
  }
  func.func @transform_3(%arg0: i32) -> (i32, i32) {
    %c0_i32 = arith.constant 0 : i32
    %c0_i32_0 = arith.constant 0 : i32
    %c0_i32_1 = arith.constant 0 : i32
    return %c0_i32, %c0_i32_0 : i32, i32
  }
  func.func @transform_4(%arg0: i32) -> (i32, i32) {
    %c0_i32 = arith.constant 0 : i32
    %c0_i32_0 = arith.constant 0 : i32
    %c0_i32_1 = arith.constant 0 : i32
    return %c0_i32, %c0_i32_0 : i32, i32
  }
  func.func @transform_5(%arg0: i32) -> (i32, i32) {
    %c0_i32 = arith.constant 0 : i32
    %c0_i32_0 = arith.constant 0 : i32
    %c0_i32_1 = arith.constant 0 : i32
    return %c0_i32, %c0_i32_0 : i32, i32
  }
  func.func @transform_6(%arg0: i32) -> (i32, i32) {
    %c0_i32 = arith.constant 0 : i32
    %c0_i32_0 = arith.constant 0 : i32
    %c0_i32_1 = arith.constant 0 : i32
    return %c0_i32, %c0_i32_0 : i32, i32
  }
  func.func @transform_7(%arg0: i32) -> (i32, i32) {
    %c0_i32 = arith.constant 0 : i32
    %c0_i32_0 = arith.constant 0 : i32
    %c0_i32_1 = arith.constant 0 : i32
    return %c0_i32, %c0_i32_0 : i32, i32
  }
  func.func @transform_8(%arg0: i32) -> (i32, i32) {
    %c0_i32 = arith.constant 0 : i32
    %c0_i32_0 = arith.constant 0 : i32
    %c0_i32_1 = arith.constant 0 : i32
    return %c0_i32, %c0_i32_0 : i32, i32
  }
  func.func @transform_9(%arg0: i32) -> (i32, i32) {
    %c0_i32 = arith.constant 0 : i32
    %c0_i32_0 = arith.constant 0 : i32
    %c0_i32_1 = arith.constant 0 : i32
    return %c0_i32, %c0_i32_0 : i32, i32
  }
  func.func @transform_10(%arg0: i32) -> (i32, i32) {
    %c0_i32 = arith.constant 0 : i32
    %c0_i32_0 = arith.constant 0 : i32
    %c0_i32_1 = arith.constant 0 : i32
    return %c0_i32, %c0_i32_0 : i32, i32
  }
  func.func @transform_11(%arg0: i32) -> (i32, i32) {
    %c0_i32 = arith.constant 0 : i32
    %c0_i32_0 = arith.constant 0 : i32
    %c0_i32_1 = arith.constant 0 : i32
    return %c0_i32, %c0_i32_0 : i32, i32
  }
  func.func @transform_12(%arg0: i32) -> (i32, i32) {
    %c0_i32 = arith.constant 0 : i32
    %c0_i32_0 = arith.constant 0 : i32
    %c0_i32_1 = arith.constant 0 : i32
    return %c0_i32, %c0_i32_0 : i32, i32
  }
  func.func @transform_13(%arg0: i32) -> (i32, i32) {
    %c0_i32 = arith.constant 0 : i32
    %c0_i32_0 = arith.constant 0 : i32
    %c0_i32_1 = arith.constant 0 : i32
    return %c0_i32, %c0_i32_0 : i32, i32
  }
  func.func @transform_14(%arg0: i32) -> (i32, i32) {
    %c0_i32 = arith.constant 0 : i32
    %c0_i32_0 = arith.constant 0 : i32
    %c0_i32_1 = arith.constant 0 : i32
    return %c0_i32, %c0_i32_0 : i32, i32
  }
}

</mosaic_0001>

<bundles_post_ra>
// kernel: tpu_custom_call.1
= control target key start
LH: loop header
LB: loop body
LE: loop exit
PB: predicated region body
PF: predicated region fallthrough
CT: control target
= control target key end

     0   :  { %19 = vsyncpa [#allocation3], 0  ;;  %s3438_s0 = inlined_call_operand.hbm [shape: f32[9,64,128], index: 0, kind: input, shape index: {}]   ;;  %s3439_s1 = inlined_call_operand.hbm [shape: f32[9,1,128], index: 1, kind: input, shape index: {}]   ;;  %s3440_s2 = inlined_call_operand.hbm [shape: f32[64,128], index: 2, kind: input, shape index: {}]   ;;  %s3441_s3 = inlined_call_operand.hbm [shape: f32[64,128], index: 3, kind: input, shape index: {}]   ;;  %s3442_s4 = inlined_call_operand.hbm [shape: bf16[128,384], index: 4, kind: input, shape index: {}]   ;;  %s3443_s5 = inlined_call_operand.vmem [shape: f32[1,384], index: 5, kind: input, shape index: {}]   ;;  %s3444_s6 = inlined_call_operand.hbm [shape: f32[1,128], index: 6, kind: input, shape index: {}]   ;;  %s3445_s7 = inlined_call_operand.hbm [shape: f32[128,128], index: 7, kind: input, shape index: {}]   ;;  %s3446_s8 = inlined_call_operand.hbm [shape: bf16[128,128], index: 8, kind: input, shape index: {}]   ;;  %s3447_s9 = inlined_call_operand.vmem [shape: f32[1,128], index: 9, kind: input, shape index: {}]   ;;  %s3448_s10 = inlined_call_operand.hbm [shape: bf16[128,512], index: 10, kind: input, shape index: {}]   ;;  %s3449_s11 = inlined_call_operand.vmem [shape: f32[1,512], index: 11, kind: input, shape index: {}]   ;;  %s3450_s12 = inlined_call_operand.hbm [shape: bf16[512,128], index: 12, kind: input, shape index: {}]   ;;  %s3451_s13 = inlined_call_operand.vmem [shape: f32[1,128], index: 13, kind: input, shape index: {}]   ;;  %s3452_s14 = inlined_call_operand.hbm [shape: f32[64,128], index: 14, kind: output, shape index: {}]  }
   0x1   :  { %20 = vsyncpa [#allocation6], 0 }
   0x2   :  { %21 = vsyncpa [#allocation9], 0 }
   0x3   :  { %22 = vsyncpa [#allocation12], 0 }
   0x4   :  { %23 = vsyncpa [#allocation15], 0 }
   0x5   :  { %24 = vsyncpa [#allocation18], 0  ;;  %s43_s15 = sshll.u32 %s3439_s1, 4  ;;  %s44_s15 = int_to_ptr.hbm [resolvable:$true] %s43_s15 }
   0x6   :  { %25 = vsyncpa [#allocation4], 0  ;;  %s2945_s16 = smov [#allocation5]   ;;  %s2946_s18 = smov 16  }
   0x7   :  { %s45_s17 = sshll.u32 %s2945_s16, 4  ;;  %s2947_s19 = smov 1   ;;  %s46_s17 = int_to_ptr.vmem [resolvable:$true] %s45_s17 }
   0x8   :  { %51 = dma.hbm_to_vmem [thread:$0]  %s44_s15, 144, %s46_s17, [#allocation6], %s2946_s18, %s2946_s18, %s2947_s19  }
   0x9   :  { %s69_s22 = sshll.u32 %s3441_s3, 4  ;;  %s2948_s23 = smov [#allocation8]   ;;  %s70_s22 = int_to_ptr.hbm [resolvable:$true] %s69_s22 }
   0xa   :  { %s71_s24 = sshll.u32 %s2948_s23, 4  ;;  %s98_s1 = sshll.u32 %s3444_s6, 4  ;;  %s72_s24 = int_to_ptr.vmem [resolvable:$true] %s71_s24  ;;  %s99_s1 = int_to_ptr.hbm [resolvable:$true] %s98_s1 }
   0xb   :  { %s2949_s27 = smov 128   ;;  %s2950_s28 = smov 8  }
   0xc   :  { %77 = dma.hbm_to_vmem [thread:$0]  %s70_s22, 1024, %s72_s24, [#allocation9], %s2949_s27, %s2949_s27, %s2950_s28  }
   0xd   :  { %s121_s15 = sshll.u32 %s3446_s8, 4  ;;  %s2951_s3 = smov [#allocation11]   ;;  %s122_s15 = int_to_ptr.hbm [resolvable:$true] %s121_s15 }
   0xe   :  { %s100_s16 = sshll.u32 %s2951_s3, 4  ;;  %s2952_s17 = smov [#allocation14]   ;;  %s101_s16 = int_to_ptr.vmem [resolvable:$true] %s100_s16 }
   0xf   :  { %103 = dma.hbm_to_vmem [thread:$0]  %s99_s1, 16, %s101_s16, [#allocation12]  }
  0x10   :  { %s123_s19 = sshll.u32 %s2952_s17, 4  ;;  %s2953_s6 = smov 64   ;;  %s124_s19 = int_to_ptr.vmem [resolvable:$true] %s123_s19 }
  0x11   :  { %s2954_s20 = smov 4   ;;  %s30_s23 = sshll.u32 %s3438_s0, 4  ;;  %s31_s23 = int_to_ptr.hbm [resolvable:$true] %s30_s23 }
  0x12   :  { %129 = dma.hbm_to_vmem [thread:$0]  %s122_s15, 1024, %s124_s19, [#allocation15], %s2953_s6, %s2953_s6, %s2954_s20  }
  0x13   :  { %s2955_s8 = smov [#allocation2]   ;;  %s56_s1 = sshll.u32 %s3440_s2, 4  ;;  %s57_s1 = int_to_ptr.hbm [resolvable:$true] %s56_s1 }
  0x14   :  { %s32_s24 = sshll.u32 %s2955_s8, 4  ;;  %s2956_s29 = smov [#allocation7]   ;;  %s33_s24 = int_to_ptr.vmem [resolvable:$true] %s32_s24 }
  0x15   :  { %38 = dma.hbm_to_vmem [thread:$0]  %s31_s23, 9216, %s33_s24, [#allocation3], %s2949_s27, %s2949_s27, %s2950_s28  }
  0x16   :  { %s58_s30 = sshll.u32 %s2956_s29, 4  ;;  %s82_s16 = sshll.u32 %s3442_s4, 4  ;;  %s59_s30 = int_to_ptr.vmem [resolvable:$true] %s58_s30  ;;  %s83_s16 = int_to_ptr.hbm [resolvable:$true] %s82_s16 }
  0x17   :  { %64 = dma.hbm_to_vmem [thread:$0]  %s57_s1, 1024, %s59_s30, [#allocation6], %s2949_s27, %s2949_s27, %s2950_s28  }
  0x18   :  { %s2957_s0 = smov [#allocation10]   ;;  %s108_s21 = sshll.u32 %s3445_s7, 4  ;;  %s109_s21 = int_to_ptr.hbm [resolvable:$true] %s108_s21 }
  0x19   :  { %s84_s17 = sshll.u32 %s2957_s0, 4  ;;  %s2958_s22 = smov 192   ;;  %s85_s17 = int_to_ptr.vmem [resolvable:$true] %s84_s17 }
  0x1a   :  { %s2959_s23 = smov 12   ;;  %s2960_s8 = smov [#allocation13]  }
  0x1b   :  { %90 = dma.hbm_to_vmem [thread:$0]  %s83_s16, 3072, %s85_s17, [#allocation9], %s2958_s22, %s2958_s22, %s2959_s23  }
  0x1c   :  { %s110_s24 = sshll.u32 %s2960_s8, 4  ;;  %s136_s26 = sshll.u32 %s3448_s10, 4  ;;  %s111_s24 = int_to_ptr.vmem [resolvable:$true] %s110_s24  ;;  %s137_s26 = int_to_ptr.hbm [resolvable:$true] %s136_s26 }
  0x1d   :  { %116 = dma.hbm_to_vmem [thread:$0]  %s109_s21, 2048, %s111_s24, [#allocation12], %s2949_s27, %s2949_s27, %s2950_s28  }
  0x1e   :  { %s2961_s1 = smov [#allocation16]   ;;  %s151_s15 = sshll.u32 %s3450_s12, 4  ;;  %s152_s15 = int_to_ptr.hbm [resolvable:$true] %s151_s15 }
  0x1f   :  { %s138_s29 = sshll.u32 %s2961_s1, 4  ;;  %s2962_s3 = smov 256   ;;  %s139_s29 = int_to_ptr.vmem [resolvable:$true] %s138_s29 }
  0x20   :  { %144 = dma.hbm_to_vmem [thread:$0]  %s137_s26, 4096, %s139_s29, [#allocation15], %s2962_s3, %s2962_s3, %s2946_s18  }
  0x21   :  { %s2963_s16 = smov [#allocation17]  }
  0x22   :  { %s153_s0 = sshll.u32 %s2963_s16, 4  ;;  %s154_s0 = int_to_ptr.vmem [resolvable:$true] %s153_s0 }
  0x23   :  { %159 = dma.hbm_to_vmem [thread:$0]  %s152_s15, 4096, %s154_s0, [#allocation18], %s2953_s6, %s2953_s6, %s2954_s20  }
  0x24   :  { %2931 = dma.done.wait [#allocation3], 9216  }
  0x25   :  { %2932 = vsyncadd [#allocation3], 4294958080 }
  0x26   :  { %2933 = dma.done.wait [#allocation6], 1168  }
  0x27   :  { %2934 = vsyncadd [#allocation6], 4294966128 }
  0x28   :  { %2935 = dma.done.wait [#allocation9], 4096  }
  0x29   :  { %2936 = vsyncadd [#allocation9], 4294963200 }
  0x2a   :  { %2937 = dma.done.wait [#allocation12], 2064  }
  0x2b   :  { %2938 = vsyncadd [#allocation12], 4294965232 }
  0x2c   :  { %2939 = dma.done.wait [#allocation15], 5120  }
  0x2d   :  { %2940 = vsyncadd [#allocation15], 4294962176 }
  0x2e   :  { %2941 = dma.done.wait [#allocation18], 4096  }
  0x2f   :  { %2942 = vsyncadd [#allocation18], 4294963200  ;;  %v2506_v0 = vld [vmem:[#allocation10 + $0xac] sm:$0xf]  ;;  %v2181_v1 = vld [vmem:[#allocation10 + $0xb4] sm:$0xf0] }
  0x30   :  { %v2503_v2 = vld [vmem:[#allocation10 + $0x94] sm:$0xf]  ;;  %v2184_v3 = vor.u32 %v2506_v0, %v2181_v1  ;;  %v2169_v4 = vld [vmem:[#allocation10 + $0x9c] sm:$0xf0]  ;;  %v2500_v6 = vld [vmem:[#allocation10 + $0x7c] sm:$0xf] }
  0x31   :  { %v2172_v5 = vor.u32 %v2503_v2, %v2169_v4  ;;  %v2157_v7 = vld [vmem:[#allocation10 + $0x84] sm:$0xf0]  ;;  %v2497_v8 = vld [vmem:[#allocation10 + $0x64] sm:$0xf]  ;;  %v2145_v9 = vld [vmem:[#allocation10 + $0x6c] sm:$0xf0] }
  0x32   :  { %680 = vmatpush.bf16.msra.mxu1 %v2184_v3  ;;  %v203_v10 = vld [vmem:[#allocation2] sm:$0xff]  ;;  %v204_v11 = vld [vmem:[#allocation2 + $0x8] sm:$0xff]  ;;  %v2160_v14 = vor.u32 %v2500_v6, %v2157_v7  ;;  %v2494_v21 = vld [vmem:[#allocation10 + $0x4c] sm:$0xf]  ;;  %v2148_v28 = vor.u32 %v2497_v8, %v2145_v9  ;;  %vm845_vm6 = vcmask 523264   ;;  %s2075_s21 = sshll.u32 %s3452_s14, 4  ;;  %s2076_s21 = int_to_ptr.hbm [resolvable:$true] %s2075_s21 }
  0x33   :  { %v3091_v12 = vld [vmem:[#allocation5] ss:$0 sm:$0xff]  ;;  %v225_v15 = vld [vmem:[#allocation2 + $0x48] sm:$0xff]  ;;  %v3093_v16 = vld [vmem:[#allocation5 + $0x1] ss:$0 sm:$0xff] }
  0x34   :  { %v224_v13 = vld [vmem:[#allocation2 + $0x40] sm:$0xff]  ;;  %v215_v17 = vmul.f32 %v3091_v12, %v203_v10  ;;  %v216_v18 = vmul.f32 %v3091_v12, %v204_v11  ;;  %v255_v20 = vld [vmem:[#allocation2 + $0x88] sm:$0xff]  ;;  %v238_v24 = vmul.f32 %v3093_v16, %v225_v15  ;;  %v205_v6 = vld [vmem:[#allocation2 + $0x10] sm:$0xff] }
  0x35   :  { %v254_v19 = vld [vmem:[#allocation2 + $0x80] sm:$0xff]  ;;  %v237_v23 = vmul.f32 %v3093_v16, %v224_v13  ;;  %v285_v27 = vld [vmem:[#allocation2 + $0xc8] sm:$0xff]  ;;  %v206_v7 = vld [vmem:[#allocation2 + $0x18] sm:$0xff] }
  0x36   :  { %681 = vmatpush.bf16.msra.mxu1 %v2172_v5  ;;  %v2133_v22 = vld [vmem:[#allocation10 + $0x54] sm:$0xf0]  ;;  %v246_v32 = vadd.f32 %v238_v24, %v216_v18  ;;  %v315_v35 = vld [vmem:[#allocation2 + $0x108] sm:$0xff]  ;;  %v2491_v41 = vld [vmem:[#allocation10 + $0x34] sm:$0xf] }
  0x37   :  { %v3099_v25 = vld [vmem:[#allocation5 + $0x2] ss:$0 sm:$0xff]  ;;  %v3101_v29 = vld [vmem:[#allocation5 + $0x3] ss:$0 sm:$0xff]  ;;  %v245_v31 = vadd.f32 %v237_v23, %v215_v17  ;;  %v3105_v36 = vld [vmem:[#allocation5 + $0x4] ss:$0 sm:$0xff]  ;;  %v2136_v50 = vor.u32 %v2494_v21, %v2133_v22 }
  0x38   :  { %v284_v26 = vld [vmem:[#allocation2 + $0xc0] sm:$0xff]  ;;  %v267_v33 = vmul.f32 %v3099_v25, %v254_v19  ;;  %v268_v34 = vmul.f32 %v3099_v25, %v255_v20  ;;  %v298_v38 = vmul.f32 %v3101_v29, %v285_v27  ;;  %v345_v40 = vld [vmem:[#allocation2 + $0x148] sm:$0xff]  ;;  %v328_v46 = vmul.f32 %v3105_v36, %v315_v35  ;;  %v226_v8 = vld [vmem:[#allocation2 + $0x50] sm:$0xff] }
  0x39   :  { %v314_v30 = vld [vmem:[#allocation2 + $0x100] sm:$0xff]  ;;  %v297_v37 = vmul.f32 %v3101_v29, %v284_v26  ;;  %v2121_v42 = vld [vmem:[#allocation10 + $0x3c] sm:$0xf0]  ;;  %v3121_v1 = vld [vmem:[#allocation5 + $0x8] ss:$0 sm:$0xff]  ;;  %v217_v19 = vmul.f32 %v3091_v12, %v205_v6  ;;  %v218_v20 = vmul.f32 %v3091_v12, %v206_v7  ;;  %v239_v21 = vmul.f32 %v3093_v16, %v226_v8 }
  0x3a   :  { %682 = vmatpush.bf16.msra.mxu1 %v2160_v14  ;;  %v344_v39 = vld [vmem:[#allocation2 + $0x140] sm:$0xff]  ;;  %v275_v43 = vadd.f32 %v267_v33, %v245_v31  ;;  %v276_v44 = vadd.f32 %v268_v34, %v246_v32  ;;  %v327_v45 = vmul.f32 %v3105_v36, %v314_v30  ;;  %v375_v49 = vld [vmem:[#allocation2 + $0x188] sm:$0xff]  ;;  %v2124_v2 = vor.u32 %v2491_v41, %v2121_v42  ;;  %v227_v14 = vld [vmem:[#allocation2 + $0x58] sm:$0xff] }
  0x3b   :  { %v3111_v47 = vld [vmem:[#allocation5 + $0x5] ss:$0 sm:$0xff]  ;;  %v3113_v51 = vld [vmem:[#allocation5 + $0x6] ss:$0 sm:$0xff]  ;;  %v405_v57 = vld [vmem:[#allocation2 + $0x1c8] sm:$0xff]  ;;  %v240_v22 = vmul.f32 %v3093_v16, %v227_v14  ;;  %v247_v35 = vadd.f32 %v239_v21, %v217_v19 }
  0x3c   :  { %v374_v48 = vld [vmem:[#allocation2 + $0x180] sm:$0xff]  ;;  %v305_v53 = vadd.f32 %v297_v37, %v275_v43  ;;  %v306_v54 = vadd.f32 %v298_v38, %v276_v44  ;;  %v357_v55 = vmul.f32 %v3111_v47, %v344_v39  ;;  %v358_v56 = vmul.f32 %v3111_v47, %v345_v40  ;;  %v435_v60 = vld [vmem:[#allocation2 + $0x208] sm:$0xff]  ;;  %v256_v15 = vld [vmem:[#allocation2 + $0x90] sm:$0xff] }
  0x3d   :  { %v404_v52 = vld [vmem:[#allocation2 + $0x1c0] sm:$0xff]  ;;  %v387_v63 = vmul.f32 %v3113_v51, %v374_v48  ;;  %v388_v0 = vmul.f32 %v3113_v51, %v375_v49  ;;  %v448_v13 = vmul.f32 %v3121_v1, %v435_v60  ;;  %v257_v17 = vld [vmem:[#allocation2 + $0x98] sm:$0xff]  ;;  %v2109_v18 = vld [vmem:[#allocation10 + $0x24] sm:$0xf0]  ;;  %v248_v37 = vadd.f32 %v240_v22, %v218_v20 }
  0x3e   :  { %683 = vmatpush.bf16.msra.mxu1 %v2148_v28  ;;  %v3117_v58 = vld [vmem:[#allocation5 + $0x7] ss:$0 sm:$0xff]  ;;  %v335_v61 = vadd.f32 %v327_v45, %v305_v53  ;;  %v336_v62 = vadd.f32 %v328_v46, %v306_v54  ;;  %v286_v23 = vld [vmem:[#allocation2 + $0xd0] sm:$0xff]  ;;  %v287_v24 = vld [vmem:[#allocation2 + $0xd8] sm:$0xff]  ;;  %v269_v28 = vmul.f32 %v3099_v25, %v256_v15  ;;  %v270_v30 = vmul.f32 %v3099_v25, %v257_v17 }
  0x3f   :  { %v434_v59 = vld [vmem:[#allocation2 + $0x200] sm:$0xff]  ;;  %v417_v4 = vmul.f32 %v3117_v58, %v404_v52  ;;  %v418_v5 = vmul.f32 %v3117_v58, %v405_v57  ;;  %v316_v31 = vld [vmem:[#allocation2 + $0x110] sm:$0xff]  ;;  %v317_v32 = vld [vmem:[#allocation2 + $0x118] sm:$0xff]  ;;  %v299_v38 = vmul.f32 %v3101_v29, %v286_v23  ;;  %v300_v39 = vmul.f32 %v3101_v29, %v287_v24 }
  0x40   :  { %v2488_v3 = vld [vmem:[#allocation10 + $0x1c] sm:$0xf]  ;;  %v365_v9 = vadd.f32 %v357_v55, %v335_v61  ;;  %v366_v10 = vadd.f32 %v358_v56, %v336_v62  ;;  %v447_v11 = vmul.f32 %v3121_v1, %v434_v59  ;;  %v2485_v33 = vld [vmem:[#allocation10 + $0x4] sm:$0xf]  ;;  %v2097_v34 = vld [vmem:[#allocation10 + $0xc] sm:$0xf0]  ;;  %v277_v49 = vadd.f32 %v269_v28, %v247_v35 }
  0x41   :  { %v346_v40 = vld [vmem:[#allocation2 + $0x150] sm:$0xff]  ;;  %v2112_v41 = vor.u32 %v2488_v3, %v2109_v18  ;;  %v347_v45 = vld [vmem:[#allocation2 + $0x158] sm:$0xff]  ;;  %v329_v52 = vmul.f32 %v3105_v36, %v316_v31  ;;  %v330_v53 = vmul.f32 %v3105_v36, %v317_v32  ;;  %v2100_v56 = vor.u32 %v2485_v33, %v2097_v34  ;;  %v207_v62 = vld [vmem:[#allocation2 + $0x20] sm:$0xff] }
  0x42   :  { %684 = vmatpush.bf16.msra.mxu1 %v2136_v50  ;;  %v395_v26 = vadd.f32 %v387_v63, %v365_v9  ;;  %v396_v27 = vadd.f32 %v388_v0, %v366_v10  ;;  %v463_v44 = vld [vmem:[#allocation7] sm:$0xff]  ;;  %v464_v48 = vld [vmem:[#allocation7 + $0x8] sm:$0xff]  ;;  %v278_v50 = vadd.f32 %v270_v30, %v248_v37  ;;  %v359_v60 = vmul.f32 %v3111_v47, %v346_v40  ;;  %v258_v7 = vld [vmem:[#allocation2 + $0xa0] sm:$0xff] }
  0x43   :  { %v376_v46 = vld [vmem:[#allocation2 + $0x190] sm:$0xff]  ;;  %v377_v54 = vld [vmem:[#allocation2 + $0x198] sm:$0xff]  ;;  %v208_v63 = vld [vmem:[#allocation2 + $0x28] sm:$0xff]  ;;  %v307_v0 = vadd.f32 %v299_v38, %v277_v49  ;;  %v360_v3 = vmul.f32 %v3111_v47, %v347_v45  ;;  %v219_v17 = vmul.f32 %v3091_v12, %v207_v62 }
  0x44   :  { %v425_v42 = vadd.f32 %v417_v4, %v395_v26  ;;  %v426_v43 = vadd.f32 %v418_v5, %v396_v27  ;;  %v406_v55 = vld [vmem:[#allocation2 + $0x1d0] sm:$0xff]  ;;  %v407_v61 = vld [vmem:[#allocation2 + $0x1d8] sm:$0xff]  ;;  %v389_v4 = vmul.f32 %v3113_v51, %v376_v46  ;;  %v228_v5 = vld [vmem:[#allocation2 + $0x60] sm:$0xff]  ;;  %v390_v10 = vmul.f32 %v3113_v51, %v377_v54 }
  0x45   :  { %v229_v6 = vld [vmem:[#allocation2 + $0x68] sm:$0xff]  ;;  %v337_v14 = vadd.f32 %v329_v52, %v307_v0  ;;  %v220_v18 = vmul.f32 %v3091_v12, %v208_v63  ;;  %v288_v19 = vld [vmem:[#allocation2 + $0xe0] sm:$0xff]  ;;  %v420_v21 = vmul.f32 %v3117_v58, %v407_v61  ;;  %v436_v22 = vld [vmem:[#allocation2 + $0x210] sm:$0xff]  ;;  %v241_v23 = vmul.f32 %v3093_v16, %v228_v5 }
  0x46   :  { %685 = vmatpush.bf16.msra.mxu1 %v2124_v2  ;;  %v455_v57 = vadd.f32 %v447_v11, %v425_v42  ;;  %v456_v59 = vadd.f32 %v448_v13, %v426_v43  ;;  %v308_v2 = vadd.f32 %v300_v39, %v278_v50  ;;  %v419_v11 = vmul.f32 %v3117_v58, %v406_v55  ;;  %v259_v13 = vld [vmem:[#allocation2 + $0xa8] sm:$0xff]  ;;  %v437_v31 = vld [vmem:[#allocation2 + $0x218] sm:$0xff]  ;;  %v318_v33 = vld [vmem:[#allocation2 + $0x120] sm:$0xff] }
  0x47   :  { %v289_v20 = vld [vmem:[#allocation2 + $0xe8] sm:$0xff]  ;;  %v242_v24 = vmul.f32 %v3093_v16, %v229_v6  ;;  %v271_v26 = vmul.f32 %v3099_v25, %v258_v7  ;;  %v367_v28 = vadd.f32 %v359_v60, %v337_v14  ;;  %v272_v32 = vmul.f32 %v3099_v25, %v259_v13  ;;  %v209_v54 = vld [vmem:[#allocation2 + $0x30] sm:$0xff]  ;;  %v231_v60 = vld [vmem:[#allocation2 + $0x78] sm:$0xff] }
  0x48   :  { %v3140_v8 = vadd.f32 %v463_v44, %v455_v57  ;;  %v3142_v9 = vadd.f32 %v464_v48, %v456_v59  ;;  %v338_v15 = vadd.f32 %v330_v53, %v308_v2  ;;  %v249_v34 = vadd.f32 %v241_v23, %v219_v17  ;;  %v319_v39 = vld [vmem:[#allocation2 + $0x128] sm:$0xff]  ;;  %v348_v48 = vld [vmem:[#allocation2 + $0x160] sm:$0xff]  ;;  %v210_v57 = vld [vmem:[#allocation2 + $0x38] sm:$0xff] }
  0x49   :  { %v250_v35 = vadd.f32 %v242_v24, %v220_v18  ;;  %v301_v37 = vmul.f32 %v3101_v29, %v288_v19  ;;  %v302_v38 = vmul.f32 %v3101_v29, %v289_v20  ;;  %v397_v40 = vadd.f32 %v389_v4, %v367_v28  ;;  %v349_v49 = vld [vmem:[#allocation2 + $0x168] sm:$0xff]  ;;  %v230_v59 = vld [vmem:[#allocation2 + $0x70] sm:$0xff]  ;;  %v465_v61 = vld [vmem:[#allocation7 + $0x10] sm:$0xff] }
  0x4a   :  { %686 = vmatpush.bf16.msra.mxu1 %v2112_v41  ;;  %v3154_v27 = vpack.c.bf16 %v3142_v9, %v3140_v8  ;;  %v368_v30 = vadd.f32 %v360_v3, %v338_v15  ;;  %v449_v42 = vmul.f32 %v3121_v1, %v436_v22  ;;  %v450_v43 = vmul.f32 %v3121_v1, %v437_v31  ;;  %v466_v3 = vld [vmem:[#allocation7 + $0x18] sm:$0xff]  ;;  %v260_v15 = vld [vmem:[#allocation2 + $0xb0] sm:$0xff]  ;;  %v261_v17 = vld [vmem:[#allocation2 + $0xb8] sm:$0xff] }
  0x4b   :  { %v279_v44 = vadd.f32 %v271_v26, %v249_v34  ;;  %v280_v45 = vadd.f32 %v272_v32, %v250_v35  ;;  %v331_v46 = vmul.f32 %v3105_v36, %v318_v33  ;;  %v427_v50 = vadd.f32 %v419_v11, %v397_v40  ;;  %v378_v5 = vld [vmem:[#allocation2 + $0x1a0] sm:$0xff]  ;;  %v379_v6 = vld [vmem:[#allocation2 + $0x1a8] sm:$0xff]  ;;  %v290_v31 = vld [vmem:[#allocation2 + $0xf0] sm:$0xff] }
  0x4c   :  { %v398_v41 = vadd.f32 %v390_v10, %v368_v30  ;;  %v332_v53 = vmul.f32 %v3105_v36, %v319_v39  ;;  %v361_v62 = vmul.f32 %v3111_v47, %v348_v48  ;;  %v362_v63 = vmul.f32 %v3111_v47, %v349_v49  ;;  %v408_v23 = vld [vmem:[#allocation2 + $0x1e0] sm:$0xff]  ;;  %v291_v32 = vld [vmem:[#allocation2 + $0xf8] sm:$0xff] }
  0x4d   :  { %v309_v55 = vadd.f32 %v301_v37, %v279_v44  ;;  %v457_v0 = vadd.f32 %v449_v42, %v427_v50  ;;  %v221_v7 = vmul.f32 %v3091_v12, %v209_v54  ;;  %v222_v11 = vmul.f32 %v3091_v12, %v210_v57  ;;  %v409_v12 = vld [vmem:[#allocation2 + $0x1e8] sm:$0xff]  ;;  %v438_v37 = vld [vmem:[#allocation2 + $0x220] sm:$0xff]  ;;  %v320_v44 = vld [vmem:[#allocation2 + $0x130] sm:$0xff] }
  0x4e   :  { %687 = vmatpush.bf16.msra.mxu1 %v2100_v56  ;;  %v428_v52 = vadd.f32 %v420_v21, %v398_v41  ;;  %v310_v56 = vadd.f32 %v302_v38, %v280_v45  ;;  %v243_v13 = vmul.f32 %v3093_v16, %v230_v59  ;;  %v244_v14 = vmul.f32 %v3093_v16, %v231_v60  ;;  %v439_v42 = vld [vmem:[#allocation2 + $0x228] sm:$0xff]  ;;  %v321_v45 = vld [vmem:[#allocation2 + $0x138] sm:$0xff]  ;;  %v2179_v57 = vld [vmem:[#allocation10 + $0xa8] sm:$0xf] }
  0x4f   :  { %v339_v4 = vadd.f32 %v331_v46, %v309_v55  ;;  %v391_v18 = vmul.f32 %v3113_v51, %v378_v5  ;;  %v392_v19 = vmul.f32 %v3113_v51, %v379_v6  ;;  %v3172_v20 = vadd.f32 %v465_v61, %v457_v0  ;;  %v2507_v59 = vld [vmem:[#allocation10 + $0xb0] sm:$0xf0]  ;;  %v2167_v60 = vld [vmem:[#allocation10 + $0x90] sm:$0xf] }
  0x50   :  { %v458_v2 = vadd.f32 %v450_v43, %v428_v52  ;;  %v340_v10 = vadd.f32 %v332_v53, %v310_v56  ;;  %v273_v24 = vmul.f32 %v3099_v25, %v260_v15  ;;  %v251_v28 = vadd.f32 %v243_v13, %v221_v7  ;;  %v350_v52 = vld [vmem:[#allocation2 + $0x170] sm:$0xff]  ;;  %v351_v53 = vld [vmem:[#allocation2 + $0x178] sm:$0xff] }
  0x51   :  { %688 = vmatmul.bf16.vlgmr.msra.gmra.mxu1 %v3154_v27  ;;  %v369_v22 = vadd.f32 %v361_v62, %v339_v4  ;;  %v252_v30 = vadd.f32 %v244_v14, %v222_v11  ;;  %v274_v16 = vmul.f32 %v3099_v25, %v261_v17  ;;  %v421_v33 = vmul.f32 %v3117_v58, %v408_v23  ;;  %v2504_v62 = vld [vmem:[#allocation10 + $0x98] sm:$0xf0]  ;;  %v381_v7 = vld [vmem:[#allocation2 + $0x1b8] sm:$0xff]  ;;  %v2501_v11 = vld [vmem:[#allocation10 + $0x80] sm:$0xf0] }
  0x52   :  { %v3174_v21 = vadd.f32 %v466_v3, %v458_v2  ;;  %v370_v26 = vadd.f32 %v362_v63, %v340_v10  ;;  %v422_v35 = vmul.f32 %v3117_v58, %v409_v12  ;;  %v303_v38 = vmul.f32 %v3101_v29, %v290_v31  ;;  %v380_v2 = vld [vmem:[#allocation2 + $0x1b0] sm:$0xff]  ;;  %v2155_v10 = vld [vmem:[#allocation10 + $0x78] sm:$0xf] }
  0x53   :  { %v304_v39 = vmul.f32 %v3101_v29, %v291_v32  ;;  %v399_v40 = vadd.f32 %v391_v18, %v369_v22  ;;  %v281_v43 = vadd.f32 %v273_v24, %v251_v28  ;;  %v282_v25 = vadd.f32 %v274_v16, %v252_v30  ;;  %v467_v13 = vld [vmem:[#allocation7 + $0x20] sm:$0xff]  ;;  %v468_v14 = vld [vmem:[#allocation7 + $0x28] sm:$0xff] }
  0x54   :  { %v3181_v34 = vpack.c.bf16 %v3174_v21, %v3172_v20  ;;  %v400_v41 = vadd.f32 %v392_v19, %v370_v26  ;;  %v451_v46 = vmul.f32 %v3121_v1, %v438_v37  ;;  %v452_v48 = vmul.f32 %v3121_v1, %v439_v42  ;;  %v410_v24 = vld [vmem:[#allocation2 + $0x1f0] sm:$0xff]  ;;  %v2143_v26 = vld [vmem:[#allocation10 + $0x60] sm:$0xf]  ;;  %v411_v28 = vld [vmem:[#allocation2 + $0x1f8] sm:$0xff] }
  0x55   :  { %v333_v49 = vmul.f32 %v3105_v36, %v320_v44  ;;  %v334_v50 = vmul.f32 %v3105_v36, %v321_v45  ;;  %v429_v29 = vadd.f32 %v421_v33, %v399_v40  ;;  %v311_v55 = vadd.f32 %v303_v38, %v281_v43  ;;  %v2498_v12 = vld [vmem:[#allocation10 + $0x68] sm:$0xf0]  ;;  %v2495_v37 = vld [vmem:[#allocation10 + $0x50] sm:$0xf0]  ;;  %v2119_v44 = vld [vmem:[#allocation10 + $0x30] sm:$0xf] }
  0x56   :  { %v430_v54 = vadd.f32 %v422_v35, %v400_v41  ;;  %v312_v56 = vadd.f32 %v304_v39, %v282_v25  ;;  %v2180_v61 = vor.u32 %v2507_v59, %v2179_v57  ;;  %v363_v63 = vmul.f32 %v3111_v47, %v350_v52  ;;  %v2131_v35 = vld [vmem:[#allocation10 + $0x48] sm:$0xf]  ;;  %v441_v39 = vld [vmem:[#allocation2 + $0x238] sm:$0xff]  ;;  %v2492_v45 = vld [vmem:[#allocation10 + $0x38] sm:$0xf0] }
  0x57   :  { %v364_v0 = vmul.f32 %v3111_v47, %v351_v53  ;;  %v2168_v36 = vor.u32 %v2504_v62, %v2167_v60  ;;  %v459_v3 = vadd.f32 %v451_v46, %v429_v29  ;;  %v341_v5 = vadd.f32 %v333_v49, %v311_v55  ;;  %v440_v38 = vld [vmem:[#allocation2 + $0x230] sm:$0xff]  ;;  %v2107_v49 = vld [vmem:[#allocation10 + $0x18] sm:$0xf]  ;;  %v469_v52 = vld [vmem:[#allocation7 + $0x30] sm:$0xff] }
  0x58   :  { %651 = vmatpush.bf16.msra.mxu0 %v2180_v61  ;;  %2581 = vmatpush.bf16.msra.mxu2 %v2180_v61  ;;  %v460_v4 = vadd.f32 %v452_v48, %v430_v54  ;;  %v342_v6 = vadd.f32 %v334_v50, %v312_v56  ;;  %v393_v15 = vmul.f32 %v3113_v51, %v380_v2  ;;  %v2489_v50 = vld [vmem:[#allocation10 + $0x20] sm:$0xf0]  ;;  %v470_v53 = vld [vmem:[#allocation7 + $0x38] sm:$0xff]  ;;  %v2095_v56 = vld [vmem:[#allocation10] sm:$0xf] }
  0x59   :  { %v394_v17 = vmul.f32 %v3113_v51, %v381_v7  ;;  %v2156_v47 = vor.u32 %v2501_v11, %v2155_v10  ;;  %v3195_v18 = vadd.f32 %v467_v13, %v459_v3  ;;  %v371_v22 = vadd.f32 %v363_v63, %v341_v5  ;;  %v3224_v2 = vld [vmem:[%s3443_s5] sm:$0x7] }
  0x5a   :  { %v3197_v19 = vadd.f32 %v468_v14, %v460_v4  ;;  %v372_v23 = vadd.f32 %v364_v0, %v342_v6  ;;  %v423_v30 = vmul.f32 %v3117_v58, %v410_v24  ;;  %v2144_v16 = vor.u32 %v2498_v12, %v2143_v26 }
  0x5b   :  { %v401_v31 = vadd.f32 %v393_v15, %v371_v22  ;;  %v424_v33 = vmul.f32 %v3117_v58, %v411_v28  ;;  %v2132_v40 = vor.u32 %v2495_v37, %v2131_v35  ;;  %v453_v43 = vmul.f32 %v3121_v1, %v440_v38 }
  0x5c   :  { %652 = vmatpush.bf16.msra.mxu0 %v2168_v36  ;;  %2582 = vmatpush.bf16.msra.mxu2 %v2168_v36  ;;  %v3202_v51 = vpack.c.bf16 %v3197_v19, %v3195_v18  ;;  %v402_v32 = vadd.f32 %v394_v17, %v372_v23  ;;  %v454_v25 = vmul.f32 %v3121_v1, %v441_v39  ;;  %v2486_v1 = vld [vmem:[#allocation10 + $0x8] sm:$0xf0]  ;;  %v518_v36 = vperm.slane %v3224_v2, 1 }
  0x5d   :  { %v431_v41 = vadd.f32 %v423_v30, %v401_v31  ;;  %v2120_v58 = vor.u32 %v2492_v45, %v2119_v44  ;;  %v2108_v29 = vor.u32 %v2489_v50, %v2107_v49  ;;  %v2096_v57 = vor.u32 %v2486_v1, %v2095_v56 }
  0x5e   :  { %v432_v42 = vadd.f32 %v424_v33, %v402_v32 }
  0x5f   :  { %v461_v46 = vadd.f32 %v453_v43, %v431_v41 }
  0x60   :  { %653 = vmatpush.bf16.msra.mxu0 %v2156_v47  ;;  %2583 = vmatpush.bf16.msra.mxu2 %v2156_v47  ;;  %v462_v48 = vadd.f32 %v454_v25, %v432_v42 }
  0x61   :  { %693 = vmatmul.bf16.gmra.mxu1 %v3181_v34  ;;  %v3208_v54 = vadd.f32 %v469_v52, %v461_v46 }
  0x62   :  { %v3210_v55 = vadd.f32 %v470_v53, %v462_v48 }
  0x64   :  { %654 = vmatpush.bf16.msra.mxu0 %v2144_v16  ;;  %2584 = vmatpush.bf16.msra.mxu2 %v2144_v16  ;;  %v3214_v59 = vpack.c.bf16 %v3210_v55, %v3208_v54 }
  0x68   :  { %655 = vmatpush.bf16.msra.mxu0 %v2132_v40  ;;  %2585 = vmatpush.bf16.msra.mxu2 %v2132_v40 }
  0x6c   :  { %656 = vmatpush.bf16.msra.mxu0 %v2120_v58  ;;  %2586 = vmatpush.bf16.msra.mxu2 %v2120_v58  ;;  %v517_v58 = vperm.slane %v3224_v2, 0 }
  0x70   :  { %657 = vmatpush.bf16.msra.mxu0 %v2108_v29  ;;  %2587 = vmatpush.bf16.msra.mxu2 %v2108_v29 }
  0x71   :  { %698 = vmatmul.bf16.gmra.mxu1 %v3202_v51 }
  0x74   :  { %658 = vmatpush.bf16.msra.mxu0 %v2096_v57  ;;  %2588 = vmatpush.bf16.msra.mxu2 %v2096_v57 }
  0x77   :  { %659 = vmatmul.bf16.vlgmr.msra.gmra.mxu0 %v3154_v27  ;;  %669 = vmatmul.bf16.vlgmr.msra.gmra.mxu2 %v3202_v51 }
  0x81   :  { %703 = vmatmul.bf16.gmra.mxu1 %v3214_v59 }
  0x87   :  { %664 = vmatmul.bf16.gmra.mxu0 %v3181_v34  ;;  %674 = vmatmul.bf16.gmra.mxu2 %v3214_v59 }
  0xce   :  { %v689_v60 = vpop.f32.mrf.mxu1 }
  0xcf   :  { %v3229_v5 = vadd.f32 %v689_v60, %v518_v36 }
  0xd1   :  { %v759_v11 = vmul.f32 %v3229_v5, %v3229_v5 }
  0xd6   :  { %v691_v61 = vpop.f32.mrf.mxu1 }
  0xd7   :  { %v3227_v4 = vadd.f32 %v691_v61, %v518_v36 }
  0xd9   :  { %v760_v7 = vmul.f32 %v3227_v4, %v3227_v4 }
  0xdb   :  { %v767_v17 = vadd.f32 %v760_v7, %v759_v11 }
  0xde   :  { %v694_v62 = vpop.f32.mrf.mxu1 }
  0xdf   :  { %v3231_v6 = vadd.f32 %v694_v62, %v518_v36 }
  0xe1   :  { %v761_v13 = vmul.f32 %v3231_v6, %v3231_v6 }
  0xe3   :  { %v768_v23 = vadd.f32 %v767_v17, %v761_v13 }
  0xe6   :  { %v696_v63 = vpop.f32.mrf.mxu1 }
  0xe7   :  { %v3235_v10 = vadd.f32 %v696_v63, %v518_v36 }
  0xe9   :  { %v762_v47 = vmul.f32 %v3235_v10, %v3235_v10 }
  0xeb   :  { %v769_v12 = vadd.f32 %v768_v23, %v762_v47 }
  0xee   :  { %v699_v0 = vpop.f32.mrf.mxu1 }
  0xef   :  { %v3241_v14 = vadd.f32 %v699_v0, %v518_v36 }
  0xf1   :  { %v763_v24 = vmul.f32 %v3241_v14, %v3241_v14 }
  0xf3   :  { %v770_v30 = vadd.f32 %v769_v12, %v763_v24 }
  0xf4   :  { %v660_v39 = vpop.f32.mrf.mxu0 }
  0xf5   :  { %v3256_v49 = vadd.f32 %v660_v39, %v517_v58 }
  0xf6   :  { %v701_v3 = vpop.f32.mrf.mxu1 }
  0xf7   :  { %v3245_v22 = vadd.f32 %v701_v3, %v518_v36  ;;  %v738_v29 = vmul.f32 %v3256_v49, %v3256_v49 }
  0xf9   :  { %v764_v28 = vmul.f32 %v3245_v22, %v3245_v22 }
  0xfa   :  { %v670_v43 = vpop.f32.mrf.mxu2 }
  0xfb   :  { %v771_v32 = vadd.f32 %v770_v30, %v764_v28  ;;  %v3268_v0 = vadd.f32 %v670_v43, %v517_v58 }
  0xfc   :  { %v662_v44 = vpop.f32.mrf.mxu0 }
  0xfd   :  { %v3258_v50 = vadd.f32 %v662_v44, %v517_v58  ;;  %v742_v17 = vmul.f32 %v3268_v0, %v3268_v0 }
  0xfe   :  { %v704_v15 = vpop.f32.mrf.mxu1 }
  0xff   :  { %v3249_v26 = vadd.f32 %v704_v15, %v518_v36  ;;  %v739_v56 = vmul.f32 %v3258_v50, %v3258_v50 }
 0x101   :  { %v765_v16 = vmul.f32 %v3249_v26, %v3249_v26  ;;  %v746_v60 = vadd.f32 %v739_v56, %v738_v29 }
 0x102   :  { %v672_v52 = vpop.f32.mrf.mxu2 }
 0x103   :  { %v772_v35 = vadd.f32 %v771_v32, %v765_v16  ;;  %v673_v15 = vadd.f32 %v672_v52, %v517_v58 }
 0x104   :  { %v665_v53 = vpop.f32.mrf.mxu0 }
 0x105   :  { %v3264_v1 = vadd.f32 %v665_v53, %v517_v58  ;;  %v743_v16 = vmul.f32 %v673_v15, %v673_v15 }
 0x106   :  { %v706_v31 = vpop.f32.mrf.mxu1 }
 0x107   :  { %v707_v33 = vadd.f32 %v706_v31, %v518_v36  ;;  %v740_v61 = vmul.f32 %v3264_v1, %v3264_v1 }
 0x109   :  { %v766_v37 = vmul.f32 %v707_v33, %v707_v33  ;;  %v747_v7 = vadd.f32 %v746_v60, %v740_v61 }
 0x10a   :  { %v675_v62 = vpop.f32.mrf.mxu2 }
 0x10b   :  { %v773_v38 = vadd.f32 %v772_v35, %v766_v37  ;;  %v676_v24 = vadd.f32 %v675_v62, %v517_v58 }
 0x10c   :  { %v667_v3 = vpop.f32.mrf.mxu0 }
 0x10d   :  { %v774_v40 = vrot.slane %v773_v38, 4  ;;  %v3270_v11 = vadd.f32 %v667_v3, %v517_v58  ;;  %v744_v37 = vmul.f32 %v676_v24, %v676_v24 }
 0x10f   :  { %v775_v41 = vadd.f32 %v774_v40, %v773_v38  ;;  %v741_v47 = vmul.f32 %v3270_v11, %v3270_v11 }
 0x111   :  { %v776_v42 = vrot.slane %v775_v41, 2  ;;  %v748_v12 = vadd.f32 %v747_v7, %v741_v47  ;;  %v791_v7 = vld [vmem:[#allocation11] sm:$0x1] }
 0x112   :  { %v677_v28 = vpop.f32.mrf.mxu2 }
 0x113   :  { %v777_v25 = vadd.f32 %v776_v42, %v775_v41  ;;  %v678_v31 = vadd.f32 %v677_v28, %v517_v58  ;;  %v749_v32 = vadd.f32 %v748_v12, %v742_v17 }
 0x115   :  { %v778_v45 = vrot.slane %v777_v25, 1  ;;  %v750_v41 = vadd.f32 %v749_v32, %v743_v16  ;;  %v745_v42 = vmul.f32 %v678_v31, %v678_v31 }
 0x117   :  { %v779_v46 = vadd.f32 %v778_v45, %v777_v25 }
 0x119   :  { %v802_v48 = vmax.f32 %v779_v46, 1e-24  ;;  %v751_v46 = vadd.f32 %v750_v41, %v744_v37 }
 0x11b   :  { %2629 = vrsqrt.f32 %v802_v48  ;;  %vm809_vm1 = vweird.f32 %v802_v48  ;;  %v752_v52 = vadd.f32 %v751_v46, %v745_v42  ;;  %v2505_v42 = vld [vmem:[#allocation10 + $0xa0] sm:$0xf0]  ;;  %v2151_v46 = vld [vmem:[#allocation10 + $0x68] sm:$0xf] }
 0x11d   :  { %v753_v53 = vrot.slane %v752_v52, 4 }
 0x121   :  { %v2630_v57 = vpop.eup %2629 }
 0x122   :  { %v804_v63 = vmul.f32 %v2630_v57, %v802_v48  ;;  %vm810_vm0 = vweird.f32 %v2630_v57 }
 0x123   :  { %vm811_vm2 = vmor %vm809_vm1, %vm810_vm0 }
 0x124   :  { %v805_v36 = vmul.f32 %v2630_v57, %v804_v63 }
 0x126   :  { %v806_v13 = vmul.f32 0.5, %v805_v36 }
 0x128   :  { %v807_v23 = vsub.f32 1.5, %v806_v13 }
 0x12a   :  { %v808_v30 = vmul.f32 %v2630_v57, %v807_v23 }
 0x12c   :  { %v812_v35 = vsel %vm811_vm2, %v2630_v57, %v808_v30 }
 0x12d   :  { %v820_v38 = vmul.f32 %v812_v35, %v707_v33  ;;  %v813_v39 = vmul.f32 %v812_v35, %v3229_v5  ;;  %v814_v40 = vmul.f32 %v812_v35, %v3227_v4  ;;  %v817_v43 = vmul.f32 %v812_v35, %v3241_v14 }
 0x12e   :  { %v818_v25 = vmul.f32 %v812_v35, %v3245_v22  ;;  %v819_v45 = vmul.f32 %v812_v35, %v3249_v26  ;;  %v754_v33 = vadd.f32 %v753_v53, %v752_v52  ;;  %v815_v4 = vmul.f32 %v812_v35, %v3231_v6  ;;  %v2139_v52 = vld [vmem:[#allocation10 + $0x50] sm:$0xf]  ;;  %v2496_v53 = vld [vmem:[#allocation10 + $0x58] sm:$0xf0] }
 0x12f   :  { %v821_v44 = vpack.c.bf16 %v814_v40, %v813_v39  ;;  %v816_v56 = vmul.f32 %v812_v35, %v3235_v10  ;;  %v2175_v40 = vld [vmem:[#allocation10 + $0x98] sm:$0xf] }
 0x130   :  { %v823_v58 = vpack.c.bf16 %v818_v25, %v817_v43  ;;  %v824_v48 = vpack.c.bf16 %v820_v38, %v819_v45  ;;  %v755_v29 = vrot.slane %v754_v33, 2  ;;  %v2176_v43 = vor.u32 %v2505_v42, %v2175_v40  ;;  %v2163_v25 = vld [vmem:[#allocation10 + $0x80] sm:$0xf] }
 0x131   :  { %829 = vxpose.xlu0.c.b16.start [1/4] (short) %v821_v44, 128  ;;  %v822_v60 = vpack.c.bf16 %v816_v56, %v815_v4  ;;  %v2502_v44 = vld [vmem:[#allocation10 + $0x88] sm:$0xf0]  ;;  %v2493_v4 = vld [vmem:[#allocation10 + $0x40] sm:$0xf0] }
 0x132   :  { %v756_v5 = vadd.f32 %v755_v29, %v754_v33  ;;  %v2164_v45 = vor.u32 %v2502_v44, %v2163_v25  ;;  %v2140_v29 = vor.u32 %v2496_v53, %v2139_v52 }
 0x134   :  { %v757_v57 = vrot.slane %v756_v5, 1 }
 0x136   :  { %v758_v14 = vadd.f32 %v757_v57, %v756_v5  ;;  %v2127_v5 = vld [vmem:[#allocation10 + $0x38] sm:$0xf]  ;;  %v2115_v57 = vld [vmem:[#allocation10 + $0x20] sm:$0xf] }
 0x137   :  { %v2128_v56 = vor.u32 %v2493_v4, %v2127_v5 }
 0x138   :  { %v780_v22 = vmax.f32 %v758_v14, 1e-24  ;;  %v2490_v14 = vld [vmem:[#allocation10 + $0x28] sm:$0xf0] }
 0x13a   :  { %2631 = vrsqrt.f32 %v780_v22  ;;  %vm787_vm3 = vweird.f32 %v780_v22 }
 0x140   :  { %v2632_v26 = vpop.eup %2631 }
 0x141   :  { %830 = vxpose.xlu0.c.b16.cont [2/4] (short) %v822_v60, 128  ;;  %v782_v61 = vmul.f32 %v2632_v26, %v780_v22  ;;  %vm788_vm4 = vweird.f32 %v2632_v26  ;;  %v2116_v60 = vor.u32 %v2490_v14, %v2115_v57  ;;  %v2103_v22 = vld [vmem:[#allocation10 + $0x8] sm:$0xf] }
 0x142   :  { %vm789_vm5 = vmor %vm787_vm3, %vm788_vm4  ;;  %v959_v14 = vld [vmem:[#allocation13 + $0x40] sm:$0xff] }
 0x143   :  { %v783_v62 = vmul.f32 %v2632_v26, %v782_v61 }
 0x145   :  { %v784_v63 = vmul.f32 0.5, %v783_v62 }
 0x147   :  { %v785_v36 = vsub.f32 1.5, %v784_v63 }
 0x149   :  { %v786_v3 = vmul.f32 %v2632_v26, %v785_v36 }
 0x14b   :  { %v790_v6 = vsel %vm789_vm5, %v2632_v26, %v786_v3  ;;  %v2487_v26 = vld [vmem:[#allocation10 + $0x10] sm:$0xf0] }
 0x14c   :  { %v792_v13 = vmul.f32 %v791_v7, %v790_v6  ;;  %v2104_v61 = vor.u32 %v2487_v26, %v2103_v22 }
 0x14e   :  { %v793_v10 = vperm.slane %v792_v13, 0  ;;  %v951_v13 = vld [vmem:[#allocation13] sm:$0xff] }
 0x150   :  { %v800_v17 = vmul.f32 %v793_v10, %v676_v24  ;;  %v801_v47 = vmul.f32 %v793_v10, %v678_v31  ;;  %v798_v23 = vmul.f32 %v793_v10, %v3268_v0  ;;  %v799_v12 = vmul.f32 %v793_v10, %v673_v15  ;;  %v2187_v24 = vld [vmem:[#allocation10 + $0xb0] sm:$0xf]  ;;  %v2508_v31 = vld [vmem:[#allocation10 + $0xb8] sm:$0xf0] }
 0x151   :  { %831 = vxpose.xlu0.c.b16.cont [3/4] (short) %v823_v58, 128  ;;  %v794_v28 = vmul.f32 %v793_v10, %v3256_v49  ;;  %v795_v30 = vmul.f32 %v793_v10, %v3258_v50  ;;  %v796_v37 = vmul.f32 %v793_v10, %v3264_v1  ;;  %v797_v38 = vmul.f32 %v793_v10, %v3270_v11  ;;  %v2499_v58 = vld [vmem:[#allocation10 + $0x70] sm:$0xf0]  ;;  %v952_v10 = vld [vmem:[#allocation13 + $0x8] sm:$0xff] }
 0x152   :  { %v828_v16 = vpack.c.bf16 %v801_v47, %v800_v17  ;;  %v827_v35 = vpack.c.bf16 %v799_v12, %v798_v23  ;;  %v2188_v41 = vor.u32 %v2508_v31, %v2187_v24 }
 0x153   :  { %v825_v32 = vpack.c.bf16 %v795_v30, %v794_v28  ;;  %v826_v39 = vpack.c.bf16 %v797_v38, %v796_v37  ;;  %v954_v37 = vld [vmem:[#allocation13 + $0x18] sm:$0xff] }
 0x154   :  { %874 = vmatpush.bf16.msra.mxu3 %v828_v16  ;;  %709 = vmatpush.bf16.msrb.mxu2 %v2188_v41  ;;  %v956_v41 = vld [vmem:[#allocation13 + $0x28] sm:$0xff] }
 0x158   :  { %875 = vmatpush.bf16.msra.mxu3 %v827_v35  ;;  %710 = vmatpush.bf16.msrb.mxu2 %v2176_v43 }
 0x15c   :  { %876 = vmatpush.bf16.msra.mxu3 %v826_v39  ;;  %711 = vmatpush.bf16.msrb.mxu2 %v2164_v45  ;;  %v957_v45 = vld [vmem:[#allocation13 + $0x30] sm:$0xff] }
 0x160   :  { %877 = vmatpush.bf16.msra.mxu3 %v825_v32 }
 0x161   :  { %832 = vxpose.xlu0.c.b16.end [4/4] (short) %v824_v48, 128  ;;  %v2152_v48 = vor.u32 %v2499_v58, %v2151_v46 }
 0x163   :  { %712 = vmatpush.bf16.msrb.mxu2 %v2152_v48 }
 0x167   :  { %713 = vmatpush.bf16.msrb.mxu2 %v2140_v29 }
 0x16b   :  { %714 = vmatpush.bf16.msrb.mxu2 %v2128_v56 }
 0x16f   :  { %715 = vmatpush.bf16.msrb.mxu2 %v2116_v60 }
 0x173   :  { %716 = vmatpush.bf16.msrb.mxu2 %v2104_v61 }
 0x176   :  { %717 = vmatmul.bf16.vlgmr.msrb.gmra.mxu2 %v3154_v27 }
 0x186   :  { %722 = vmatmul.bf16.gmra.mxu2 %v3181_v34  ;;  %v953_v34 = vld [vmem:[#allocation13 + $0x10] sm:$0xff] }
 0x196   :  { %727 = vmatmul.bf16.gmra.mxu2 %v3202_v51 }
 0x1a6   :  { %732 = vmatmul.bf16.gmra.mxu2 %v3214_v59 }
 0x1dd   :  { %v837_v0 = vpop.trf.xlu0 }
 0x1de   :  { %2189 = vmatmul.msk.bf16.vlgmr.msra.gmra.mxu3 %vm845_vm6, %v837_v0 }
 0x1ed   :  { %v838_v49 = vpop.trf.xlu0 }
 0x1ee   :  { %2190 = vmatmul.msk.bf16.gmra.mxu3 %vm845_vm6, %v838_v49 }
 0x1fd   :  { %v839_v50 = vpop.trf.xlu0 }
 0x1fe   :  { %2191 = vmatmul.msk.bf16.gmra.mxu3 %vm845_vm6, %v839_v50 }
 0x20d   :  { %v840_v15 = vpop.trf.xlu0 }
 0x20e   :  { %2192 = vmatmul.msk.bf16.gmra.mxu3 %vm845_vm6, %v840_v15  ;;  %v955_v15 = vld [vmem:[#allocation13 + $0x20] sm:$0xff] }
 0x21d   :  { %v841_v1 = vpop.trf.xlu0 }
 0x21e   :  { %2193 = vmatmul.msk.bf16.gmra.mxu3 %vm845_vm6, %v841_v1 }
 0x22d   :  { %v842_v11 = vpop.trf.xlu0 }
 0x22e   :  { %2194 = vmatmul.msk.bf16.gmra.mxu3 %vm845_vm6, %v842_v11 }
 0x23d   :  { %v843_v33 = vpop.trf.xlu0 }
 0x23e   :  { %2195 = vmatmul.msk.bf16.gmra.mxu3 %vm845_vm6, %v843_v33  ;;  %v958_v33 = vld [vmem:[#allocation13 + $0x38] sm:$0xff] }
 0x24d   :  { %v844_v62 = vpop.trf.xlu0 }
 0x24e   :  { %2196 = vmatmul.msk.bf16.gmra.mxu3 %vm845_vm6, %v844_v62 }
 0x261   :  { %v879_v63 = vpop.f32.mrf.mxu3 }
 0x262   :  { %v919_v36 = vmul.f32 1.442695, %v879_v63  ;;  %v960_v63 = vld [vmem:[#allocation13 + $0x48] sm:$0xff] }
 0x264   :  { %2633 = vpow2.f32 %v919_v36 }
 0x269   :  { %v881_v3 = vpop.f32.mrf.mxu3 }
 0x26a   :  { %v921_v7 = vmul.f32 1.442695, %v881_v3  ;;  %v2634_v6 = vpop.eup %2633 }
 0x26b   :  { %v3299_v12 = vmul.f32 %v2634_v6, %v951_v13 }
 0x26c   :  { %2635 = vpow2.f32 %v921_v7 }
 0x271   :  { %v884_v17 = vpop.f32.mrf.mxu3 }
 0x272   :  { %v2636_v47 = vpop.eup %2635  ;;  %v923_v23 = vmul.f32 1.442695, %v884_v17 }
 0x273   :  { %v3301_v28 = vmul.f32 %v2636_v47, %v952_v10  ;;  %v961_v10 = vld [vmem:[#allocation13 + $0x50] sm:$0xff] }
 0x274   :  { %2637 = vpow2.f32 %v923_v23 }
 0x275   :  { %v983_v27 = vadd.f32 %v3301_v28, %v3299_v12 }
 0x279   :  { %v886_v30 = vpop.f32.mrf.mxu3 }
 0x27a   :  { %v2638_v16 = vpop.eup %2637  ;;  %v925_v32 = vmul.f32 1.442695, %v886_v30  ;;  %v962_v30 = vld [vmem:[#allocation13 + $0x58] sm:$0xff] }
 0x27b   :  { %v3305_v35 = vmul.f32 %v2638_v16, %v953_v34 }
 0x27c   :  { %2639 = vpow2.f32 %v925_v32 }
 0x27d   :  { %v984_v51 = vadd.f32 %v983_v27, %v3305_v35 }
 0x281   :  { %v889_v38 = vpop.f32.mrf.mxu3 }
 0x282   :  { %v2640_v39 = vpop.eup %2639  ;;  %v927_v0 = vmul.f32 1.442695, %v889_v38 }
 0x283   :  { %v3309_v49 = vmul.f32 %v2640_v39, %v954_v37  ;;  %v963_v39 = vld [vmem:[#allocation13 + $0x60] sm:$0xff] }
 0x284   :  { %2641 = vpow2.f32 %v927_v0 }
 0x285   :  { %v985_v50 = vadd.f32 %v984_v51, %v3309_v49 }
 0x289   :  { %v891_v1 = vpop.f32.mrf.mxu3 }
 0x28a   :  { %v2642_v11 = vpop.eup %2641  ;;  %v929_v24 = vmul.f32 1.442695, %v891_v1 }
 0x28b   :  { %v3312_v31 = vmul.f32 %v2642_v11, %v955_v15 }
 0x28c   :  { %2643 = vpow2.f32 %v929_v24  ;;  %v964_v24 = vld [vmem:[#allocation13 + $0x68] sm:$0xff] }
 0x28d   :  { %v986_v40 = vadd.f32 %v985_v50, %v3312_v31 }
 0x291   :  { %v894_v59 = vpop.f32.mrf.mxu3 }
 0x292   :  { %v2644_v42 = vpop.eup %2643  ;;  %v931_v43 = vmul.f32 1.442695, %v894_v59 }
 0x293   :  { %v3315_v25 = vmul.f32 %v2644_v42, %v956_v41 }
 0x294   :  { %2645 = vpow2.f32 %v931_v43 }
 0x295   :  { %v987_v44 = vadd.f32 %v986_v40, %v3315_v25 }
 0x299   :  { %v896_v46 = vpop.f32.mrf.mxu3 }
 0x29a   :  { %v2646_v58 = vpop.eup %2645  ;;  %v933_v48 = vmul.f32 1.442695, %v896_v46 }
 0x29b   :  { %v3318_v52 = vmul.f32 %v2646_v58, %v957_v45 }
 0x29c   :  { %2647 = vpow2.f32 %v933_v48 }
 0x29d   :  { %v988_v53 = vadd.f32 %v987_v44, %v3318_v52  ;;  %v965_v44 = vld [vmem:[#allocation13 + $0x70] sm:$0xff] }
 0x2a1   :  { %v899_v29 = vpop.f32.mrf.mxu3 }
 0x2a2   :  { %v2648_v5 = vpop.eup %2647  ;;  %v935_v4 = vmul.f32 1.442695, %v899_v29 }
 0x2a3   :  { %v3321_v56 = vmul.f32 %v2648_v5, %v958_v33  ;;  %v966_v33 = vld [vmem:[#allocation13 + $0x78] sm:$0xff] }
 0x2a4   :  { %2649 = vpow2.f32 %v935_v4 }
 0x2a5   :  { %v989_v57 = vadd.f32 %v988_v53, %v3321_v56 }
 0x2a9   :  { %v901_v60 = vpop.f32.mrf.mxu3 }
 0x2aa   :  { %v2650_v22 = vpop.eup %2649  ;;  %v937_v26 = vmul.f32 1.442695, %v901_v60 }
 0x2ab   :  { %v975_v61 = vmul.f32 %v2650_v22, %v959_v14  ;;  %v718_v14 = vpop.f32.mrf.mxu2 }
 0x2ac   :  { %2651 = vpow2.f32 %v937_v26 }
 0x2ad   :  { %v990_v62 = vadd.f32 %v989_v57, %v975_v61 }
 0x2b1   :  { %v904_v36 = vpop.f32.mrf.mxu3 }
 0x2b2   :  { %v2652_v3 = vpop.eup %2651  ;;  %v939_v7 = vmul.f32 1.442695, %v904_v36  ;;  %v1010_v36 = vpack.c.bf16 %v3315_v25, %v3312_v31 }
 0x2b3   :  { %v976_v6 = vmul.f32 %v2652_v3, %v960_v63  ;;  %v1011_v63 = vpack.c.bf16 %v3321_v56, %v3318_v52 }
 0x2b4   :  { %2653 = vpow2.f32 %v939_v7  ;;  %v519_v7 = vperm.slane %v3224_v2, 2  ;;  %v2515_v2 = vld [vmem:[#allocation14 + $0x30] sm:$0xff] }
 0x2b5   :  { %v991_v13 = vadd.f32 %v990_v62, %v976_v6  ;;  %v1012_v26 = vpack.c.bf16 %v976_v6, %v975_v61  ;;  %v720_v62 = vpop.f32.mrf.mxu2  ;;  %v1008_v61 = vpack.c.bf16 %v3301_v28, %v3299_v12 }
 0x2b9   :  { %v906_v17 = vpop.f32.mrf.mxu3 }
 0x2ba   :  { %v2654_v47 = vpop.eup %2653  ;;  %v941_v23 = vmul.f32 1.442695, %v906_v17  ;;  %v721_v17 = vadd.f32 %v720_v62, %v519_v7 }
 0x2bb   :  { %v977_v27 = vmul.f32 %v2654_v47, %v961_v10  ;;  %v719_v10 = vadd.f32 %v718_v14, %v519_v7 }
 0x2bc   :  { %2655 = vpow2.f32 %v941_v23  ;;  %v2516_v23 = vld [vmem:[#allocation14 + $0x38] sm:$0xff] }
 0x2bd   :  { %v992_v34 = vadd.f32 %v991_v13, %v977_v27  ;;  %v723_v3 = vpop.f32.mrf.mxu2  ;;  %v1009_v13 = vpack.c.bf16 %v3309_v49, %v3305_v35  ;;  %v1004_v6 = vpack.c.bf16 %v721_v17, %v719_v10  ;;  %1122 = vmatpush.bf16.msrb.mxu1 %v2516_v23  ;;  %v2514_v35 = vld [vmem:[#allocation14 + $0x28] sm:$0xff]  ;;  %v2547_v10 = vld [vmem:[#allocation16 + $0xec] sm:$0xf0]  ;;  %v2529_v17 = vld [vmem:[#allocation16 + $0x64] sm:$0xf] }
 0x2be   :  { %v724_v47 = vadd.f32 %v723_v3, %v519_v7  ;;  %v2297_v3 = vld [vmem:[#allocation16 + $0x90] sm:$0xf0] }
 0x2c1   :  { %v909_v16 = vpop.f32.mrf.mxu3  ;;  %1123 = vmatpush.bf16.msrb.mxu1 %v2515_v2  ;;  %v2543_v2 = vld [vmem:[#allocation16 + $0xcc] sm:$0xf0] }
 0x2c2   :  { %v2656_v32 = vpop.eup %2655  ;;  %v943_v51 = vmul.f32 1.442695, %v909_v16  ;;  %v2512_v16 = vld [vmem:[#allocation14 + $0x18] sm:$0xff] }
 0x2c3   :  { %v978_v37 = vmul.f32 %v2656_v32, %v962_v30  ;;  %v2513_v30 = vld [vmem:[#allocation14 + $0x20] sm:$0xff]  ;;  %v2511_v32 = vld [vmem:[#allocation14 + $0x10] sm:$0xff] }
 0x2c4   :  { %2657 = vpow2.f32 %v943_v51  ;;  %v2510_v51 = vld [vmem:[#allocation14 + $0x8] sm:$0xff] }
 0x2c5   :  { %v993_v38 = vadd.f32 %v992_v34, %v978_v37  ;;  %v1013_v22 = vpack.c.bf16 %v978_v37, %v977_v27  ;;  %v725_v52 = vpop.f32.mrf.mxu2  ;;  %1124 = vmatpush.bf16.msrb.mxu1 %v2514_v35  ;;  %v2544_v35 = vld [vmem:[#allocation16 + $0xd4] sm:$0xf0] }
 0x2c6   :  { %v726_v31 = vadd.f32 %v725_v52, %v519_v7  ;;  %v2351_v52 = vld [vmem:[#allocation16 + $0xe8] sm:$0xf] }
 0x2c8   :  { %v1005_v25 = vpack.c.bf16 %v726_v31, %v724_v47  ;;  %v2327_v47 = vld [vmem:[#allocation16 + $0xc0] sm:$0xf] }
 0x2c9   :  { %v911_v0 = vpop.f32.mrf.mxu3  ;;  %1125 = vmatpush.bf16.msrb.mxu1 %v2513_v30  ;;  %v2525_v30 = vld [vmem:[#allocation16 + $0x44] sm:$0xf] }
 0x2ca   :  { %v2658_v50 = vpop.eup %2657  ;;  %v945_v15 = vmul.f32 1.442695, %v911_v0 }
 0x2cb   :  { %v979_v1 = vmul.f32 %v2658_v50, %v963_v39  ;;  %v2509_v50 = vld [vmem:[#allocation14] sm:$0xff] }
 0x2cc   :  { %2659 = vpow2.f32 %v945_v15 }
 0x2cd   :  { %v994_v11 = vadd.f32 %v993_v38, %v979_v1  ;;  %v728_v56 = vpop.f32.mrf.mxu2  ;;  %1126 = vmatpush.bf16.msrb.mxu1 %v2512_v16  ;;  %v2265_v16 = vld [vmem:[#allocation16 + $0x50] sm:$0xf0] }
 0x2ce   :  { %v729_v49 = vadd.f32 %v728_v56, %v519_v7  ;;  %v2548_v56 = vld [vmem:[#allocation16 + $0xf4] sm:$0xf0] }
 0x2cf   :  { %v2352_v23 = vor.u32 %v2548_v56, %v2351_v52 }
 0x2d1   :  { %v914_v40 = vpop.f32.mrf.mxu3  ;;  %1127 = vmatpush.bf16.msrb.mxu1 %v2511_v32  ;;  %v2319_v32 = vld [vmem:[#allocation16 + $0xa8] sm:$0xf] }
 0x2d2   :  { %v2660_v41 = vpop.eup %2659  ;;  %v947_v59 = vmul.f32 1.442695, %v914_v40  ;;  %v2545_v40 = vld [vmem:[#allocation16 + $0xe4] sm:$0xf] }
 0x2d3   :  { %v980_v42 = vmul.f32 %v2660_v41, %v964_v24  ;;  %v2345_v41 = vld [vmem:[#allocation16 + $0xf0] sm:$0xf0] }
 0x2d4   :  { %2661 = vpow2.f32 %v947_v59 }
 0x2d5   :  { %v995_v43 = vadd.f32 %v994_v11, %v980_v42  ;;  %v1014_v60 = vpack.c.bf16 %v980_v42, %v979_v1  ;;  %v730_v27 = vpop.f32.mrf.mxu2  ;;  %1128 = vmatpush.bf16.msrb.mxu1 %v2510_v51  ;;  %v2348_v42 = vor.u32 %v2545_v40, %v2345_v41  ;;  %v2540_v51 = vld [vmem:[#allocation16 + $0xb4] sm:$0xf0]  ;;  %v2535_v40 = vld [vmem:[#allocation16 + $0x8c] sm:$0xf0] }
 0x2d6   :  { %v731_v34 = vadd.f32 %v730_v27, %v519_v7  ;;  %v2335_v27 = vld [vmem:[#allocation16 + $0xc8] sm:$0xf] }
 0x2d7   :  { %1406 = vmatpush.bf16.msrb.mxu3 %v2348_v42  ;;  %v2249_v42 = vld [vmem:[#allocation16 + $0x30] sm:$0xf0] }
 0x2d8   :  { %v1006_v28 = vpack.c.bf16 %v731_v34, %v729_v49  ;;  %v2328_v49 = vor.u32 %v2543_v2, %v2327_v47  ;;  %v2311_v34 = vld [vmem:[#allocation16 + $0xa0] sm:$0xf] }
 0x2d9   :  { %v916_v45 = vpop.f32.mrf.mxu3  ;;  %1129 = vmatpush.bf16.msrb.mxu1 %v2509_v50 }
 0x2da   :  { %v2662_v46 = vpop.eup %2661  ;;  %v949_v58 = vmul.f32 1.442695, %v916_v45 }
 0x2db   :  { %v981_v48 = vmul.f32 %v2662_v46, %v965_v44 }
 0x2dc   :  { %2663 = vpow2.f32 %v949_v58 }
 0x2dd   :  { %v996_v53 = vadd.f32 %v995_v43, %v981_v48  ;;  %v733_v12 = vpop.f32.mrf.mxu2 }
 0x2de   :  { %v734_v38 = vadd.f32 %v733_v12, %v519_v7  ;;  %v2336_v12 = vor.u32 %v2544_v35, %v2335_v27  ;;  %v2530_v27 = vld [vmem:[#allocation16 + $0x6c] sm:$0xf]  ;;  %v2289_v35 = vld [vmem:[#allocation16 + $0x78] sm:$0xf0] }
 0x2e2   :  { %v2664_v29 = vpop.eup %2663 }
 0x2e3   :  { %v982_v5 = vmul.f32 %v2664_v29, %v966_v33  ;;  %v2329_v33 = vld [vmem:[#allocation16 + $0xd0] sm:$0xf0] }
 0x2e5   :  { %v1015_v4 = vpack.c.bf16 %v982_v5, %v981_v48  ;;  %v997_v57 = vadd.f32 %v996_v53, %v982_v5  ;;  %v735_v37 = vpop.f32.mrf.mxu2  ;;  %v2541_v53 = vld [vmem:[#allocation16 + $0xc4] sm:$0xf] }
 0x2e6   :  { %v736_v39 = vadd.f32 %v735_v37, %v519_v7  ;;  %v2332_v29 = vor.u32 %v2541_v53, %v2329_v33  ;;  %v2343_v7 = vld [vmem:[#allocation16 + $0xe0] sm:$0xf]  ;;  %v2546_v37 = vld [vmem:[#allocation16 + $0xec] sm:$0xf]  ;;  %v2321_v53 = vld [vmem:[#allocation16 + $0xb8] sm:$0xf0] }
 0x2e7   :  { %1016 = vmatpush.bf16.msrb.mxu0 %v1015_v4  ;;  %v998_v15 = vrot.slane %v997_v57, 4 }
 0x2e8   :  { %v1007_v0 = vpack.c.bf16 %v736_v39, %v734_v38  ;;  %1407 = vmatpush.bf16.msrb.mxu3 %v2332_v29  ;;  %v2353_v38 = vld [vmem:[#allocation16 + $0xf8] sm:$0xf0]  ;;  %v2268_v39 = vor.u32 %v2525_v30, %v2265_v16  ;;  %v2523_v30 = vld [vmem:[#allocation16 + $0x2c] sm:$0xf0]  ;;  %v2233_v16 = vld [vmem:[#allocation16 + $0x10] sm:$0xf0] }
 0x2e9   :  { %v999_v1 = vadd.f32 %v998_v15, %v997_v57  ;;  %v2295_v15 = vld [vmem:[#allocation16 + $0x80] sm:$0xf] }
 0x2eb   :  { %1017 = vmatpush.bf16.msrb.mxu0 %v1014_v60  ;;  %v1000_v11 = vrot.slane %v999_v1, 2 }
 0x2ed   :  { %v1001_v24 = vadd.f32 %v1000_v11, %v999_v1  ;;  %v2542_v1 = vld [vmem:[#allocation16 + $0xcc] sm:$0xf]  ;;  %v2337_v11 = vld [vmem:[#allocation16 + $0xd8] sm:$0xf0] }
 0x2ee   :  { %v2340_v41 = vor.u32 %v2542_v1, %v2337_v11  ;;  %v2231_v11 = vld [vmem:[#allocation16] sm:$0xf] }
 0x2ef   :  { %1018 = vmatpush.bf16.msrb.mxu0 %v1013_v22  ;;  %v1002_v59 = vrot.slane %v1001_v24, 1  ;;  %v2537_v22 = vld [vmem:[#allocation16 + $0xa4] sm:$0xf] }
 0x2f1   :  { %v1003_v43 = vadd.f32 %v1002_v59, %v1001_v24  ;;  %v2320_v24 = vor.u32 %v2540_v51, %v2319_v32  ;;  %v2521_v59 = vld [vmem:[#allocation16 + $0x24] sm:$0xf]  ;;  %v2255_v32 = vld [vmem:[#allocation16 + $0x28] sm:$0xf]  ;;  %v2524_v51 = vld [vmem:[#allocation16 + $0x34] sm:$0xf0] }
 0x2f3   :  { %1019 = vmatpush.bf16.msrb.mxu0 %v1012_v26  ;;  %2665 = vrcp.f32 %v1003_v43  ;;  %v2313_v26 = vld [vmem:[#allocation16 + $0xb0] sm:$0xf0]  ;;  %v2303_v43 = vld [vmem:[#allocation16 + $0x88] sm:$0xf] }
 0x2f4   :  { %v2316_v62 = vor.u32 %v2537_v22, %v2313_v26 }
 0x2f6   :  { %1408 = vmatpush.bf16.msrb.mxu3 %v2316_v62  ;;  %v2532_v62 = vld [vmem:[#allocation16 + $0x74] sm:$0xf0] }
 0x2f7   :  { %1020 = vmatpush.bf16.msrb.mxu0 %v1011_v63 }
 0x2f9   :  { %v3333_v45 = vpop.eup %2665 }
 0x2fb   :  { %1021 = vmatpush.bf16.msrb.mxu0 %v1010_v36  ;;  %v2533_v36 = vld [vmem:[#allocation16 + $0x84] sm:$0xf] }
 0x2ff   :  { %1022 = vmatpush.bf16.msrb.mxu0 %v1009_v13  ;;  %v2300_v13 = vor.u32 %v2533_v36, %v2297_v3  ;;  %v2305_v36 = vld [vmem:[#allocation16 + $0x98] sm:$0xf0] }
 0x301   :  { %1409 = vmatpush.bf16.msrb.mxu3 %v2300_v13  ;;  %v2263_v13 = vld [vmem:[#allocation16 + $0x40] sm:$0xf] }
 0x303   :  { %1023 = vmatpush.bf16.msrb.mxu0 %v1008_v61  ;;  %v2281_v61 = vld [vmem:[#allocation16 + $0x70] sm:$0xf0] }
 0x306   :  { %1024 = vmatmul.bf16.vlgmr.msrb.gmra.mxu0 %v1004_v6  ;;  %v2344_v6 = vor.u32 %v2547_v10, %v2343_v7  ;;  %v2527_v10 = vld [vmem:[#allocation16 + $0x4c] sm:$0xf0] }
 0x307   :  { %1435 = vmatpush.bf16.msra.mxu0 %v2352_v23  ;;  %v2264_v56 = vor.u32 %v2527_v10, %v2263_v13  ;;  %v2571_v13 = vld [vmem:[#allocation17 + $0xb0] sm:$0xff] }
 0x308   :  { %1377 = vmatpush.bf16.msra.mxu2 %v2344_v6  ;;  %v2528_v6 = vld [vmem:[#allocation16 + $0x54] sm:$0xf0]  ;;  %v2563_v10 = vld [vmem:[#allocation17 + $0x70] sm:$0xff] }
 0x30b   :  { %1436 = vmatpush.bf16.msra.mxu0 %v2336_v12  ;;  %v2517_v12 = vld [vmem:[#allocation16 + $0x4] sm:$0xf] }
 0x30c   :  { %1378 = vmatpush.bf16.msra.mxu2 %v2328_v49  ;;  %v2292_v49 = vor.u32 %v2530_v27, %v2289_v35  ;;  %v2561_v35 = vld [vmem:[#allocation17 + $0x60] sm:$0xff] }
 0x30f   :  { %1437 = vmatpush.bf16.msra.mxu0 %v2320_v24  ;;  %v2519_v24 = vld [vmem:[#allocation16 + $0xc] sm:$0xf0] }
 0x316   :  { %1029 = vmatmul.bf16.gmra.mxu0 %v1005_v25  ;;  %v2284_v25 = vor.u32 %v2529_v17, %v2281_v61  ;;  %v2271_v61 = vld [vmem:[#allocation16 + $0x48] sm:$0xf] }
 0x317   :  { %v2272_v47 = vor.u32 %v2528_v6, %v2271_v61  ;;  %v2554_v61 = vld [vmem:[#allocation17 + $0x28] sm:$0xff] }
 0x318   :  { %1410 = vmatpush.bf16.msrb.mxu3 %v2284_v25 }
 0x31c   :  { %1411 = vmatpush.bf16.msrb.mxu3 %v2268_v39  ;;  %v2526_v39 = vld [vmem:[#allocation16 + $0x4c] sm:$0xf] }
 0x326   :  { %1034 = vmatmul.bf16.gmra.mxu0 %v1006_v28  ;;  %v2539_v28 = vld [vmem:[#allocation16 + $0xac] sm:$0xf0] }
 0x327   :  { %v2312_v50 = vor.u32 %v2539_v28, %v2311_v34  ;;  %v2247_v34 = vld [vmem:[#allocation16 + $0x20] sm:$0xf] }
 0x328   :  { %v2248_v28 = vor.u32 %v2523_v30, %v2247_v34 }
 0x329   :  { %1379 = vmatpush.bf16.msra.mxu2 %v2312_v50 }
 0x336   :  { %1039 = vmatmul.bf16.gmra.mxu0 %v1007_v0  ;;  %v2356_v0 = vor.u32 %v2546_v37, %v2353_v38  ;;  %v2236_v37 = vor.u32 %v2517_v12, %v2233_v16  ;;  %v2256_v38 = vor.u32 %v2524_v51, %v2255_v32  ;;  %v2560_v51 = vld [vmem:[#allocation17 + $0x58] sm:$0xff] }
 0x338   :  { %1464 = vmatpush.bf16.msra.mxu1 %v2356_v0  ;;  %v2273_v0 = vld [vmem:[#allocation16 + $0x58] sm:$0xf0] }
 0x339   :  { %v2276_v50 = vor.u32 %v2526_v39, %v2273_v0  ;;  %v2566_v39 = vld [vmem:[#allocation17 + $0x88] sm:$0xff]  ;;  %v2551_v0 = vld [vmem:[#allocation17 + $0x10] sm:$0xff] }
 0x33c   :  { %1465 = vmatpush.bf16.msra.mxu1 %v2340_v41  ;;  %v2232_v41 = vor.u32 %v2519_v24, %v2231_v11  ;;  %v2576_v11 = vld [vmem:[#allocation17 + $0xd8] sm:$0xff]  ;;  %v2549_v24 = vld [vmem:[#allocation17] sm:$0xff] }
 0x383   :  { %v1025_v44 = vpop.f32.mrf.mxu0 }
 0x384   :  { %v1046_v58 = vmul.f32 %v3333_v45, %v1025_v44  ;;  %v2536_v44 = vld [vmem:[#allocation16 + $0x94] sm:$0xf0] }
 0x38b   :  { %v1027_v46 = vpop.f32.mrf.mxu0 }
 0x38c   :  { %v1047_v48 = vmul.f32 %v3333_v45, %v1027_v46  ;;  %v2538_v46 = vld [vmem:[#allocation16 + $0xac] sm:$0xf] }
 0x38d   :  { %v2324_v22 = vor.u32 %v2538_v46, %v2321_v53  ;;  %v3347_v53 = vld [vmem:[%s3447_s9] ss:$0 sm:$0xff] }
 0x38e   :  { %v1054_v5 = vpack.c.bf16 %v1047_v48, %v1046_v58  ;;  %v2252_v48 = vor.u32 %v2521_v59, %v2249_v42  ;;  %v2520_v59 = vld [vmem:[#allocation16 + $0x14] sm:$0xf0]  ;;  %v2518_v42 = vld [vmem:[#allocation16 + $0xc] sm:$0xf] }
 0x38f   :  { %1466 = vmatpush.bf16.msra.mxu1 %v2324_v22 }
 0x390   :  { %1130 = vmatmul.bf16.vlgmr.msrb.gmra.mxu1 %v1054_v5  ;;  %v2296_v5 = vor.u32 %v2535_v40, %v2295_v15  ;;  %1412 = vmatpush.bf16.msrb.mxu3 %v2252_v48  ;;  %v2257_v15 = vld [vmem:[#allocation16 + $0x38] sm:$0xf0]  ;;  %v2239_v40 = vld [vmem:[#allocation16 + $0x8] sm:$0xf] }
 0x392   :  { %1380 = vmatpush.bf16.msra.mxu2 %v2296_v5 }
 0x393   :  { %v1030_v4 = vpop.f32.mrf.mxu0 }
 0x394   :  { %v1048_v14 = vmul.f32 %v3333_v45, %v1030_v4  ;;  %v2304_v4 = vor.u32 %v2536_v44, %v2303_v43  ;;  %1413 = vmatpush.bf16.msrb.mxu3 %v2236_v37  ;;  %v2241_v43 = vld [vmem:[#allocation16 + $0x18] sm:$0xf0]  ;;  %v2240_v44 = vor.u32 %v2520_v59, %v2239_v40  ;;  %v2567_v37 = vld [vmem:[#allocation17 + $0x90] sm:$0xff]  ;;  %v2557_v40 = vld [vmem:[#allocation17 + $0x40] sm:$0xff] }
 0x395   :  { %v2244_v46 = vor.u32 %v2518_v42, %v2241_v43  ;;  %v2575_v59 = vld [vmem:[#allocation17 + $0xd0] sm:$0xff] }
 0x396   :  { %1438 = vmatpush.bf16.msra.mxu0 %v2304_v4 }
 0x39b   :  { %v1032_v57 = vpop.f32.mrf.mxu0 }
 0x39c   :  { %v1049_v60 = vmul.f32 %v3333_v45, %v1032_v57  ;;  %v2279_v57 = vld [vmem:[#allocation16 + $0x60] sm:$0xf] }
 0x39e   :  { %v1055_v63 = vpack.c.bf16 %v1049_v60, %v1048_v14  ;;  %v2531_v14 = vld [vmem:[#allocation16 + $0x6c] sm:$0xf0]  ;;  %v2287_v60 = vld [vmem:[#allocation16 + $0x68] sm:$0xf] }
 0x39f   :  { %v2280_v3 = vor.u32 %v2531_v14, %v2279_v57  ;;  %v2288_v7 = vor.u32 %v2532_v62, %v2287_v60 }
 0x3a0   :  { %1135 = vmatmul.bf16.gmra.mxu1 %v1055_v63  ;;  %v2534_v63 = vld [vmem:[#allocation16 + $0x8c] sm:$0xf] }
 0x3a1   :  { %v2308_v17 = vor.u32 %v2534_v63, %v2305_v36  ;;  %1381 = vmatpush.bf16.msra.mxu2 %v2280_v3  ;;  %1439 = vmatpush.bf16.msra.mxu0 %v2288_v7  ;;  %v2572_v36 = vld [vmem:[#allocation17 + $0xb8] sm:$0xff] }
 0x3a2   :  { %v2556_v3 = vld [vmem:[#allocation17 + $0x38] sm:$0xff] }
 0x3a3   :  { %v1035_v31 = vpop.f32.mrf.mxu0  ;;  %1467 = vmatpush.bf16.msra.mxu1 %v2308_v17  ;;  %v2564_v7 = vld [vmem:[#allocation17 + $0x78] sm:$0xff]  ;;  %v2570_v17 = vld [vmem:[#allocation17 + $0xa8] sm:$0xff] }
 0x3a4   :  { %v1050_v33 = vmul.f32 %v3333_v45, %v1035_v31  ;;  %1958 = vmatpush.bf16.msra.mxu3 %v2564_v7 }
 0x3a5   :  { %1382 = vmatpush.bf16.msra.mxu2 %v2264_v56  ;;  %1440 = vmatpush.bf16.msra.mxu0 %v2272_v47 }
 0x3a7   :  { %1468 = vmatpush.bf16.msra.mxu1 %v2292_v49  ;;  %v2552_v49 = vld [vmem:[#allocation17 + $0x18] sm:$0xff] }
 0x3a8   :  { %1959 = vmatpush.bf16.msra.mxu3 %v2563_v10 }
 0x3a9   :  { %1383 = vmatpush.bf16.msra.mxu2 %v2248_v28  ;;  %1441 = vmatpush.bf16.msra.mxu0 %v2256_v38  ;;  %v2579_v38 = vld [vmem:[#allocation17 + $0xf0] sm:$0xff] }
 0x3ab   :  { %v1037_v58 = vpop.f32.mrf.mxu0  ;;  %1469 = vmatpush.bf16.msra.mxu1 %v2276_v50  ;;  %v2559_v50 = vld [vmem:[#allocation17 + $0x50] sm:$0xff] }
 0x3ac   :  { %v1051_v29 = vmul.f32 %v3333_v45, %v1037_v58 }
 0x3ad   :  { %1384 = vmatpush.bf16.msra.mxu2 %v2232_v41  ;;  %1442 = vmatpush.bf16.msra.mxu0 %v2240_v44  ;;  %v1207_v41 = vld [vmem:[%s3449_s11] sm:$0xf]  ;;  %v2574_v44 = vld [vmem:[#allocation17 + $0xc8] sm:$0xff] }
 0x3ae   :  { %v1056_v26 = vpack.c.bf16 %v1051_v29, %v1050_v33  ;;  %v3367_v42 = vperm.slane %v1207_v41, 2  ;;  %v3369_v43 = vperm.slane %v1207_v41, 3 }
 0x3b0   :  { %1140 = vmatmul.bf16.gmra.mxu1 %v1056_v26 }
 0x3b1   :  { %1987 = vmatpush.bf16.msrb.mxu0 %v2572_v36  ;;  %1929 = vmatpush.bf16.msrb.mxu2 %v2556_v3 }
 0x3b3   :  { %v1040_v52 = vpop.f32.mrf.mxu0 }
 0x3b4   :  { %v1052_v25 = vmul.f32 %v3333_v45, %v1040_v52  ;;  %v2562_v52 = vld [vmem:[#allocation17 + $0x68] sm:$0xff] }
 0x3b5   :  { %1988 = vmatpush.bf16.msrb.mxu0 %v2571_v13  ;;  %1960 = vmatpush.bf16.msra.mxu3 %v2562_v52 }
 0x3b9   :  { %1989 = vmatpush.bf16.msrb.mxu0 %v2570_v17  ;;  %1961 = vmatpush.bf16.msra.mxu3 %v2561_v35 }
 0x3bb   :  { %v1042_v31 = vpop.f32.mrf.mxu0 }
 0x3bc   :  { %v1053_v23 = vmul.f32 %v3333_v45, %v1042_v31  ;;  %v2522_v45 = vld [vmem:[#allocation16 + $0x2c] sm:$0xf]  ;;  %v2569_v31 = vld [vmem:[#allocation17 + $0xa0] sm:$0xff] }
 0x3bd   :  { %v2260_v1 = vor.u32 %v2522_v45, %v2257_v15  ;;  %1990 = vmatpush.bf16.msrb.mxu0 %v2569_v31  ;;  %1962 = vmatpush.bf16.msra.mxu3 %v2560_v51  ;;  %v2577_v45 = vld [vmem:[#allocation17 + $0xe0] sm:$0xff]  ;;  %v2550_v15 = vld [vmem:[#allocation17 + $0x8] sm:$0xff] }
 0x3be   :  { %v1057_v2 = vpack.c.bf16 %v1053_v23, %v1052_v25  ;;  %v2553_v25 = vld [vmem:[#allocation17 + $0x20] sm:$0xff] }
 0x3bf   :  { %1470 = vmatpush.bf16.msra.mxu1 %v2260_v1  ;;  %v2558_v1 = vld [vmem:[#allocation17 + $0x48] sm:$0xff] }
 0x3c0   :  { %1145 = vmatmul.bf16.gmra.mxu1 %v1057_v2 }
 0x3c1   :  { %1963 = vmatpush.bf16.msra.mxu3 %v2559_v50 }
 0x3c3   :  { %1471 = vmatpush.bf16.msra.mxu1 %v2244_v46 }
 0x3c5   :  { %1964 = vmatpush.bf16.msra.mxu3 %v2558_v1 }
 0x3c9   :  { %1965 = vmatpush.bf16.msra.mxu3 %v2557_v40 }
 0x40d   :  { %v1131_v58 = vpop.f32.mrf.mxu1 }
 0x40e   :  { %v1151_v48 = vadd.f32 %v1131_v58, %v3140_v8 }
 0x410   :  { %v1163_v5 = vadd.f32 %v3347_v53, %v1151_v48 }
 0x415   :  { %v1133_v33 = vpop.f32.mrf.mxu1 }
 0x416   :  { %v1152_v29 = vadd.f32 %v1133_v33, %v3142_v9  ;;  %v3373_v33 = vperm.slane %v1207_v41, 0 }
 0x418   :  { %v1164_v4 = vadd.f32 %v3347_v53, %v1152_v29  ;;  %v3375_v29 = vperm.slane %v1207_v41, 1 }
 0x41a   :  { %v1171_v57 = vpack.c.bf16 %v1164_v4, %v1163_v5 }
 0x41c   :  { %1385 = vmatmul.bf16.vlgmr.msra.gmra.mxu2 %v1171_v57  ;;  %1414 = vmatmul.bf16.vlgmr.msrb.gmra.mxu3 %v1171_v57 }
 0x41d   :  { %1443 = vmatmul.bf16.vlgmr.msra.gmra.mxu0 %v1171_v57  ;;  %1472 = vmatmul.bf16.vlgmr.msra.gmra.mxu1 %v1171_v57  ;;  %v1136_v14 = vpop.f32.mrf.mxu1  ;;  %v2573_v57 = vld [vmem:[#allocation17 + $0xc0] sm:$0xff] }
 0x41e   :  { %v1153_v8 = vadd.f32 %v1136_v14, %v3172_v20  ;;  %v2555_v20 = vld [vmem:[#allocation17 + $0x30] sm:$0xff] }
 0x41f   :  { %1930 = vmatpush.bf16.msrb.mxu2 %v2555_v20 }
 0x420   :  { %v1165_v26 = vadd.f32 %v3347_v53, %v1153_v8 }
 0x423   :  { %1931 = vmatpush.bf16.msrb.mxu2 %v2554_v61 }
 0x425   :  { %v1138_v60 = vpop.f32.mrf.mxu1 }
 0x426   :  { %v1154_v22 = vadd.f32 %v1138_v60, %v3174_v21  ;;  %v2580_v21 = vld [vmem:[#allocation17 + $0xf8] sm:$0xff] }
 0x427   :  { %2589 = vmatpush.bf16.msrb.mxu1 %v2580_v21  ;;  %1932 = vmatpush.bf16.msrb.mxu2 %v2553_v25 }
 0x428   :  { %v1166_v62 = vadd.f32 %v3347_v53, %v1154_v22 }
 0x42a   :  { %v1172_v9 = vpack.c.bf16 %v1166_v62, %v1165_v26 }
 0x42b   :  { %1933 = vmatpush.bf16.msrb.mxu2 %v2552_v49  ;;  %2590 = vmatpush.bf16.msrb.mxu1 %v2579_v38 }
 0x42c   :  { %1390 = vmatmul.bf16.gmra.mxu2 %v1172_v9  ;;  %1419 = vmatmul.bf16.gmra.mxu3 %v1172_v9 }
 0x42d   :  { %1448 = vmatmul.bf16.gmra.mxu0 %v1172_v9  ;;  %1477 = vmatmul.bf16.gmra.mxu1 %v1172_v9  ;;  %v1141_v63 = vpop.f32.mrf.mxu1 }
 0x42e   :  { %v1155_v6 = vadd.f32 %v1141_v63, %v3195_v18  ;;  %v2568_v18 = vld [vmem:[#allocation17 + $0x98] sm:$0xff] }
 0x42f   :  { %1991 = vmatpush.bf16.msrb.mxu0 %v2568_v18  ;;  %1934 = vmatpush.bf16.msrb.mxu2 %v2551_v0 }
 0x430   :  { %v1167_v23 = vadd.f32 %v3347_v53, %v1155_v6 }
 0x433   :  { %1992 = vmatpush.bf16.msrb.mxu0 %v2567_v37  ;;  %1935 = vmatpush.bf16.msrb.mxu2 %v2550_v15 }
 0x435   :  { %v1143_v56 = vpop.f32.mrf.mxu1 }
 0x436   :  { %v1156_v47 = vadd.f32 %v1143_v56, %v3197_v19 }
 0x437   :  { %1993 = vmatpush.bf16.msrb.mxu0 %v2566_v39  ;;  %1936 = vmatpush.bf16.msrb.mxu2 %v2549_v24 }
 0x438   :  { %v1168_v2 = vadd.f32 %v3347_v53, %v1156_v47 }
 0x43a   :  { %v1173_v27 = vpack.c.bf16 %v1168_v2, %v1167_v23 }
 0x43c   :  { %1395 = vmatmul.bf16.gmra.mxu2 %v1173_v27  ;;  %1424 = vmatmul.bf16.gmra.mxu3 %v1173_v27 }
 0x43d   :  { %1453 = vmatmul.bf16.gmra.mxu0 %v1173_v27  ;;  %1482 = vmatmul.bf16.gmra.mxu1 %v1173_v27  ;;  %v1146_v19 = vpop.f32.mrf.mxu1 }
 0x43e   :  { %v1157_v34 = vadd.f32 %v1146_v19, %v3208_v54  ;;  %v2578_v54 = vld [vmem:[#allocation17 + $0xe8] sm:$0xff] }
 0x43f   :  { %2591 = vmatpush.bf16.msrb.mxu1 %v2578_v54 }
 0x440   :  { %v1169_v28 = vadd.f32 %v3347_v53, %v1157_v34 }
 0x443   :  { %2592 = vmatpush.bf16.msrb.mxu1 %v2577_v45 }
 0x445   :  { %v1148_v30 = vpop.f32.mrf.mxu1 }
 0x446   :  { %v1158_v12 = vadd.f32 %v1148_v30, %v3210_v55  ;;  %v2565_v55 = vld [vmem:[#allocation17 + $0x80] sm:$0xff] }
 0x447   :  { %1994 = vmatpush.bf16.msrb.mxu0 %v2565_v55  ;;  %2593 = vmatpush.bf16.msrb.mxu1 %v2576_v11 }
 0x448   :  { %v1170_v16 = vadd.f32 %v3347_v53, %v1158_v12 }
 0x44a   :  { %v1174_v32 = vpack.c.bf16 %v1170_v16, %v1169_v28 }
 0x44b   :  { %2016 = vmatpush.bf16.msra.mxu0 %v2580_v21  ;;  %2594 = vmatpush.bf16.msrb.mxu1 %v2575_v59 }
 0x44c   :  { %1400 = vmatmul.bf16.gmra.mxu2 %v1174_v32  ;;  %1429 = vmatmul.bf16.gmra.mxu3 %v1174_v32 }
 0x44d   :  { %1458 = vmatmul.bf16.gmra.mxu0 %v1174_v32  ;;  %1487 = vmatmul.bf16.gmra.mxu1 %v1174_v32 }
 0x44f   :  { %2017 = vmatpush.bf16.msra.mxu0 %v2579_v38  ;;  %2595 = vmatpush.bf16.msrb.mxu1 %v2574_v44 }
 0x453   :  { %2018 = vmatpush.bf16.msra.mxu0 %v2578_v54  ;;  %2596 = vmatpush.bf16.msrb.mxu1 %v2573_v57 }
 0x457   :  { %2019 = vmatpush.bf16.msra.mxu0 %v2577_v45 }
 0x45b   :  { %2020 = vmatpush.bf16.msra.mxu0 %v2576_v11 }
 0x45f   :  { %2021 = vmatpush.bf16.msra.mxu0 %v2575_v59 }
 0x463   :  { %2022 = vmatpush.bf16.msra.mxu0 %v2574_v44 }
 0x467   :  { %2023 = vmatpush.bf16.msra.mxu0 %v2573_v57 }
 0x49a   :  { %v1444_v46 = vpop.f32.mrf.mxu0  ;;  %v1473_v58 = vpop.f32.mrf.mxu1 }
 0x49b   :  { %v1445_v48 = vadd.f32 %v1444_v46, %v3367_v42  ;;  %v1474_v53 = vadd.f32 %v1473_v58, %v3369_v43 }
 0x49d   :  { %v1495_v5 = vadd.f32 3.0, %v1445_v48  ;;  %v1496_v4 = vadd.f32 3.0, %v1474_v53 }
 0x49f   :  { %v1527_v14 = vmax.f32 %v1495_v5, 0.0  ;;  %v1528_v8 = vmax.f32 %v1496_v4, 0.0  ;;  %v1386_v60 = vpop.f32.mrf.mxu2  ;;  %v1415_v22 = vpop.f32.mrf.mxu3 }
 0x4a0   :  { %v1387_v26 = vadd.f32 %v1386_v60, %v3373_v33  ;;  %v1416_v62 = vadd.f32 %v1415_v22, %v3375_v29 }
 0x4a1   :  { %v1559_v9 = vmin.f32 %v1527_v14, 6.0  ;;  %v1560_v63 = vmin.f32 %v1528_v8, 6.0 }
 0x4a2   :  { %v1493_v36 = vadd.f32 3.0, %v1387_v26  ;;  %v1494_v3 = vadd.f32 3.0, %v1416_v62  ;;  %v1446_v7 = vpop.f32.mrf.mxu0  ;;  %v1475_v13 = vpop.f32.mrf.mxu1 }
 0x4a3   :  { %v1447_v20 = vadd.f32 %v1446_v7, %v3367_v42  ;;  %v1476_v10 = vadd.f32 %v1475_v13, %v3369_v43  ;;  %v1591_v52 = vmul.f32 %v1559_v9, %v1445_v48  ;;  %v1592_v56 = vmul.f32 %v1560_v63, %v1474_v53 }
 0x4a4   :  { %v1525_v21 = vmax.f32 %v1493_v36, 0.0  ;;  %v1526_v17 = vmax.f32 %v1494_v3, 0.0 }
 0x4a5   :  { %v1499_v61 = vadd.f32 3.0, %v1447_v20  ;;  %v1500_v6 = vadd.f32 3.0, %v1476_v10  ;;  %v1623_v34 = vmul.f32 0.16666667, %v1591_v52  ;;  %v3383_v30 = vmul.f32 0.16666667, %v1592_v56 }
 0x4a6   :  { %v1557_v2 = vmin.f32 %v1525_v21, 6.0  ;;  %v1558_v27 = vmin.f32 %v1526_v17, 6.0 }
 0x4a7   :  { %v1531_v47 = vmax.f32 %v1499_v61, 0.0  ;;  %v1532_v31 = vmax.f32 %v1500_v6, 0.0  ;;  %v1388_v25 = vpop.f32.mrf.mxu2  ;;  %v1417_v23 = vpop.f32.mrf.mxu3 }
 0x4a8   :  { %v1389_v35 = vadd.f32 %v1388_v25, %v3373_v33  ;;  %v1418_v18 = vadd.f32 %v1417_v23, %v3375_v29  ;;  %v1589_v54 = vmul.f32 %v1557_v2, %v1387_v26  ;;  %v1590_v0 = vmul.f32 %v1558_v27, %v1416_v62 }
 0x4a9   :  { %v1563_v49 = vmin.f32 %v1531_v47, 6.0  ;;  %v1564_v19 = vmin.f32 %v1532_v31, 6.0 }
 0x4aa   :  { %v1497_v12 = vadd.f32 3.0, %v1389_v35  ;;  %v1498_v28 = vadd.f32 3.0, %v1418_v18  ;;  %v1449_v16 = vpop.f32.mrf.mxu0  ;;  %v1478_v32 = vpop.f32.mrf.mxu1  ;;  %v1621_v14 = vmul.f32 0.16666667, %v1589_v54  ;;  %v1622_v8 = vmul.f32 0.16666667, %v1590_v0 }
 0x4ab   :  { %v1595_v51 = vmul.f32 %v1563_v49, %v1447_v20  ;;  %v1596_v37 = vmul.f32 %v1564_v19, %v1476_v10  ;;  %v1450_v38 = vadd.f32 %v1449_v16, %v3367_v42  ;;  %v1479_v39 = vadd.f32 %v1478_v32, %v3369_v43 }
 0x4ac   :  { %v1529_v50 = vmax.f32 %v1497_v12, 0.0  ;;  %v1530_v55 = vmax.f32 %v1498_v28, 0.0 }
 0x4ad   :  { %v1627_v45 = vmul.f32 0.16666667, %v1595_v51  ;;  %v3387_v15 = vmul.f32 0.16666667, %v1596_v37  ;;  %v1503_v1 = vadd.f32 3.0, %v1450_v38  ;;  %v1504_v11 = vadd.f32 3.0, %v1479_v39 }
 0x4ae   :  { %v1561_v24 = vmin.f32 %v1529_v50, 6.0  ;;  %v1562_v40 = vmin.f32 %v1530_v55, 6.0 }
 0x4af   :  { %v1655_v41 = vpack.c.bf16 %v1627_v45, %v1623_v34  ;;  %v1656_v59 = vpack.c.bf16 %v3387_v15, %v3383_v30  ;;  %v1535_v44 = vmax.f32 %v1503_v1, 0.0  ;;  %v1536_v46 = vmax.f32 %v1504_v11, 0.0  ;;  %v1391_v58 = vpop.f32.mrf.mxu2  ;;  %v1420_v48 = vpop.f32.mrf.mxu3 }
 0x4b0   :  { %v1593_v53 = vmul.f32 %v1561_v24, %v1389_v35  ;;  %v1594_v5 = vmul.f32 %v1562_v40, %v1418_v18  ;;  %v1392_v4 = vadd.f32 %v1391_v58, %v3373_v33  ;;  %v1421_v57 = vadd.f32 %v1420_v48, %v3375_v29 }
 0x4b1   :  { %v1567_v60 = vmin.f32 %v1535_v44, 6.0  ;;  %v1568_v22 = vmin.f32 %v1536_v46, 6.0  ;;  %1995 = vmatmul.bf16.vlgmr.msrb.gmra.mxu0 %v1655_v41 }
 0x4b2   :  { %v1625_v26 = vmul.f32 0.16666667, %v1593_v53  ;;  %v1626_v62 = vmul.f32 0.16666667, %v1594_v5  ;;  %v1501_v9 = vadd.f32 3.0, %v1392_v4  ;;  %v1502_v63 = vadd.f32 3.0, %v1421_v57  ;;  %v1451_v36 = vpop.f32.mrf.mxu0  ;;  %v1480_v3 = vpop.f32.mrf.mxu1 }
 0x4b3   :  { %v1452_v7 = vadd.f32 %v1451_v36, %v3367_v42  ;;  %v1481_v13 = vadd.f32 %v1480_v3, %v3369_v43  ;;  %v1599_v52 = vmul.f32 %v1567_v60, %v1450_v38  ;;  %v1600_v56 = vmul.f32 %v1568_v22, %v1479_v39 }
 0x4b4   :  { %v1653_v20 = vpack.c.bf16 %v1625_v26, %v1621_v14  ;;  %v1654_v10 = vpack.c.bf16 %v1626_v62, %v1622_v8  ;;  %v1533_v21 = vmax.f32 %v1501_v9, 0.0  ;;  %v1534_v17 = vmax.f32 %v1502_v63, 0.0 }
 0x4b5   :  { %v1507_v61 = vadd.f32 3.0, %v1452_v7  ;;  %v1508_v6 = vadd.f32 3.0, %v1481_v13  ;;  %v1631_v34 = vmul.f32 0.16666667, %v1599_v52  ;;  %v1632_v12 = vmul.f32 0.16666667, %v1600_v56 }
 0x4b6   :  { %1937 = vmatmul.bf16.vlgmr.msrb.gmra.mxu2 %v1653_v20  ;;  %1966 = vmatmul.bf16.vlgmr.msra.gmra.mxu3 %v1654_v10  ;;  %v1565_v2 = vmin.f32 %v1533_v21, 6.0  ;;  %v1566_v27 = vmin.f32 %v1534_v17, 6.0 }
 0x4b7   :  { %v1539_v47 = vmax.f32 %v1507_v61, 0.0  ;;  %v1540_v31 = vmax.f32 %v1508_v6, 0.0  ;;  %v1393_v25 = vpop.f32.mrf.mxu2  ;;  %v1422_v23 = vpop.f32.mrf.mxu3 }
 0x4b8   :  { %v1394_v35 = vadd.f32 %v1393_v25, %v3373_v33  ;;  %v1423_v18 = vadd.f32 %v1422_v23, %v3375_v29  ;;  %v1597_v0 = vmul.f32 %v1565_v2, %v1392_v4  ;;  %v1598_v50 = vmul.f32 %v1566_v27, %v1421_v57 }
 0x4b9   :  { %v1571_v49 = vmin.f32 %v1539_v47, 6.0  ;;  %v1572_v19 = vmin.f32 %v1540_v31, 6.0 }
 0x4ba   :  { %v1505_v28 = vadd.f32 3.0, %v1394_v35  ;;  %v1506_v16 = vadd.f32 3.0, %v1423_v18  ;;  %v1454_v32 = vpop.f32.mrf.mxu0  ;;  %v1483_v51 = vpop.f32.mrf.mxu1  ;;  %v1629_v57 = vmul.f32 0.16666667, %v1597_v0  ;;  %v1630_v26 = vmul.f32 0.16666667, %v1598_v50 }
 0x4bb   :  { %v1603_v37 = vmul.f32 %v1571_v49, %v1452_v7  ;;  %v1604_v38 = vmul.f32 %v1572_v19, %v1481_v13  ;;  %v1455_v39 = vadd.f32 %v1454_v32, %v3367_v42  ;;  %v1484_v54 = vadd.f32 %v1483_v51, %v3369_v43 }
 0x4bc   :  { %v1537_v55 = vmax.f32 %v1505_v28, 0.0  ;;  %v1538_v45 = vmax.f32 %v1506_v16, 0.0 }
 0x4bd   :  { %v1635_v1 = vmul.f32 0.16666667, %v1603_v37  ;;  %v1636_v11 = vmul.f32 0.16666667, %v1604_v38  ;;  %v1511_v24 = vadd.f32 3.0, %v1455_v39  ;;  %v1512_v40 = vadd.f32 3.0, %v1484_v54 }
 0x4be   :  { %v1569_v41 = vmin.f32 %v1537_v55, 6.0  ;;  %v1570_v44 = vmin.f32 %v1538_v45, 6.0 }
 0x4bf   :  { %v1660_v46 = vpack.c.bf16 %v1636_v11, %v1632_v12  ;;  %v1543_v58 = vmax.f32 %v1511_v24, 0.0  ;;  %v1544_v48 = vmax.f32 %v1512_v40, 0.0  ;;  %v1396_v53 = vpop.f32.mrf.mxu2  ;;  %v1425_v5 = vpop.f32.mrf.mxu3  ;;  %v1659_v14 = vpack.c.bf16 %v1635_v1, %v1631_v34 }
 0x4c0   :  { %v1601_v8 = vmul.f32 %v1569_v41, %v1394_v35  ;;  %v1602_v60 = vmul.f32 %v1570_v44, %v1423_v18  ;;  %v1397_v22 = vadd.f32 %v1396_v53, %v3373_v33  ;;  %v1426_v4 = vadd.f32 %v1425_v5, %v3375_v29 }
 0x4c1   :  { %v1575_v62 = vmin.f32 %v1543_v58, 6.0  ;;  %v1576_v9 = vmin.f32 %v1544_v48, 6.0  ;;  %2000 = vmatmul.bf16.gmra.mxu0 %v1659_v14  ;;  %2029 = vmatmul.bf16.vlgmr.msrb.gmra.mxu1 %v1660_v46 }
 0x4c2   :  { %v1633_v63 = vmul.f32 0.16666667, %v1601_v8  ;;  %v1634_v36 = vmul.f32 0.16666667, %v1602_v60  ;;  %v1509_v3 = vadd.f32 3.0, %v1397_v22  ;;  %v1510_v7 = vadd.f32 3.0, %v1426_v4  ;;  %v1456_v13 = vpop.f32.mrf.mxu0  ;;  %v1485_v20 = vpop.f32.mrf.mxu1 }
 0x4c3   :  { %v1457_v10 = vadd.f32 %v1456_v13, %v3367_v42  ;;  %v1486_v21 = vadd.f32 %v1485_v20, %v3369_v43  ;;  %v1607_v31 = vmul.f32 %v1575_v62, %v1455_v39  ;;  %v1608_v25 = vmul.f32 %v1576_v9, %v1484_v54 }
 0x4c4   :  { %v1541_v17 = vmax.f32 %v1509_v3, 0.0  ;;  %v1542_v61 = vmax.f32 %v1510_v7, 0.0  ;;  %v1657_v6 = vpack.c.bf16 %v1633_v63, %v1629_v57  ;;  %v1658_v52 = vpack.c.bf16 %v1634_v36, %v1630_v26 }
 0x4c5   :  { %v1515_v56 = vadd.f32 3.0, %v1457_v10  ;;  %v1516_v47 = vadd.f32 3.0, %v1486_v21  ;;  %v1639_v16 = vmul.f32 0.16666667, %v1607_v31  ;;  %v1640_v32 = vmul.f32 0.16666667, %v1608_v25 }
 0x4c6   :  { %1942 = vmatmul.bf16.gmra.mxu2 %v1657_v6  ;;  %1971 = vmatmul.bf16.gmra.mxu3 %v1658_v52  ;;  %v1573_v18 = vmin.f32 %v1541_v17, 6.0  ;;  %v1574_v49 = vmin.f32 %v1542_v61, 6.0 }
 0x4c7   :  { %v1547_v23 = vmax.f32 %v1515_v56, 0.0  ;;  %v1548_v2 = vmax.f32 %v1516_v47, 0.0  ;;  %v1398_v27 = vpop.f32.mrf.mxu2  ;;  %v1427_v35 = vpop.f32.mrf.mxu3 }
 0x4c8   :  { %v1399_v19 = vadd.f32 %v1398_v27, %v3373_v33  ;;  %v1428_v34 = vadd.f32 %v1427_v35, %v3375_v29  ;;  %v1605_v45 = vmul.f32 %v1573_v18, %v1397_v22  ;;  %v1606_v1 = vmul.f32 %v1574_v49, %v1426_v4 }
 0x4c9   :  { %v1579_v12 = vmin.f32 %v1547_v23, 6.0  ;;  %v1580_v28 = vmin.f32 %v1548_v2, 6.0 }
 0x4ca   :  { %v1513_v51 = vadd.f32 3.0, %v1399_v19  ;;  %v1514_v37 = vadd.f32 3.0, %v1428_v34  ;;  %v1459_v38 = vpop.f32.mrf.mxu0  ;;  %v1488_v39 = vpop.f32.mrf.mxu1  ;;  %v1637_v4 = vmul.f32 0.16666667, %v1605_v45  ;;  %v1638_v9 = vmul.f32 0.16666667, %v1606_v1 }
 0x4cb   :  { %v1611_v54 = vmul.f32 %v1579_v12, %v1457_v10  ;;  %v1612_v0 = vmul.f32 %v1580_v28, %v1486_v21  ;;  %v1460_v50 = vadd.f32 %v1459_v38, %v3367_v42  ;;  %v1489_v55 = vadd.f32 %v1488_v39, %v3369_v43 }
 0x4cc   :  { %v1545_v11 = vmax.f32 %v1513_v51, 0.0  ;;  %v1546_v24 = vmax.f32 %v1514_v37, 0.0 }
 0x4cd   :  { %v1643_v40 = vmul.f32 0.16666667, %v1611_v54  ;;  %v1644_v41 = vmul.f32 0.16666667, %v1612_v0  ;;  %v1519_v44 = vadd.f32 3.0, %v1460_v50  ;;  %v1520_v46 = vadd.f32 3.0, %v1489_v55 }
 0x4ce   :  { %v1577_v58 = vmin.f32 %v1545_v11, 6.0  ;;  %v1578_v48 = vmin.f32 %v1546_v24, 6.0 }
 0x4cf   :  { %v1551_v53 = vmax.f32 %v1519_v44, 0.0  ;;  %v1401_v5 = vpop.f32.mrf.mxu2  ;;  %v1430_v14 = vpop.f32.mrf.mxu3  ;;  %v1663_v8 = vpack.c.bf16 %v1643_v40, %v1639_v16  ;;  %v1664_v60 = vpack.c.bf16 %v1644_v41, %v1640_v32  ;;  %v1552_v63 = vmax.f32 %v1520_v46, 0.0 }
 0x4d0   :  { %v1609_v57 = vmul.f32 %v1577_v58, %v1399_v19  ;;  %v1610_v26 = vmul.f32 %v1578_v48, %v1428_v34  ;;  %v1402_v62 = vadd.f32 %v1401_v5, %v3373_v33  ;;  %v1431_v22 = vadd.f32 %v1430_v14, %v3375_v29 }
 0x4d1   :  { %2005 = vmatmul.bf16.gmra.mxu0 %v1663_v8  ;;  %2034 = vmatmul.bf16.gmra.mxu1 %v1664_v60  ;;  %v1583_v61 = vmin.f32 %v1551_v53, 6.0  ;;  %v1584_v56 = vmin.f32 %v1552_v63, 6.0 }
 0x4d2   :  { %v1641_v36 = vmul.f32 0.16666667, %v1609_v57  ;;  %v1642_v3 = vmul.f32 0.16666667, %v1610_v26  ;;  %v1517_v7 = vadd.f32 3.0, %v1402_v62  ;;  %v1518_v13 = vadd.f32 3.0, %v1431_v22  ;;  %v1461_v20 = vpop.f32.mrf.mxu0  ;;  %v1490_v10 = vpop.f32.mrf.mxu1 }
 0x4d3   :  { %v1462_v21 = vadd.f32 %v1461_v20, %v3367_v42  ;;  %v1491_v17 = vadd.f32 %v1490_v10, %v3369_v43  ;;  %v1615_v49 = vmul.f32 %v1583_v61, %v1460_v50  ;;  %v1616_v43 = vmul.f32 %v1584_v56, %v1489_v55  ;;  %v2047_v10 = vld [vmem:[#allocation8 + $0x10] sm:$0xff] }
 0x4d4   :  { %v1661_v6 = vpack.c.bf16 %v1641_v36, %v1637_v4  ;;  %v1662_v52 = vpack.c.bf16 %v1642_v3, %v1638_v9  ;;  %v1549_v47 = vmax.f32 %v1517_v7, 0.0  ;;  %v1550_v23 = vmax.f32 %v1518_v13, 0.0  ;;  %v3421_v36 = vld [vmem:[%s3451_s13] ss:$0 sm:$0xff]  ;;  %s2964_s13 = smov [#allocation19]  }
 0x4d5   :  { %v1523_v31 = vadd.f32 3.0, %v1462_v21  ;;  %v1524_v25 = vadd.f32 3.0, %v1491_v17  ;;  %v1647_v39 = vmul.f32 0.16666667, %v1615_v49  ;;  %v1648_v45 = vmul.f32 0.16666667, %v1616_v43 }
 0x4d6   :  { %1947 = vmatmul.bf16.gmra.mxu2 %v1661_v6  ;;  %1976 = vmatmul.bf16.gmra.mxu3 %v1662_v52  ;;  %v1581_v34 = vmin.f32 %v1549_v47, 6.0  ;;  %v1582_v16 = vmin.f32 %v1550_v23, 6.0  ;;  %s2073_s17 = sshll.u32 %s2964_s13, 4  ;;  %s2074_s17 = int_to_ptr.vmem [resolvable:$true] %s2073_s17 }
 0x4d7   :  { %v1555_v2 = vmax.f32 %v1523_v31, 0.0  ;;  %v1556_v27 = vmax.f32 %v1524_v25, 0.0  ;;  %v1403_v35 = vpop.f32.mrf.mxu2  ;;  %v1432_v18 = vpop.f32.mrf.mxu3  ;;  %v2048_v25 = vld [vmem:[#allocation8 + $0x18] sm:$0xff] }
 0x4d8   :  { %v1404_v19 = vadd.f32 %v1403_v35, %v3373_v33  ;;  %v1433_v42 = vadd.f32 %v1432_v18, %v3375_v29  ;;  %v1613_v1 = vmul.f32 %v1581_v34, %v1402_v62  ;;  %v1614_v24 = vmul.f32 %v1582_v16, %v1431_v22  ;;  %v2049_v34 = vld [vmem:[#allocation8 + $0x20] sm:$0xff] }
 0x4d9   :  { %v1587_v12 = vmin.f32 %v1555_v2, 6.0  ;;  %v1588_v28 = vmin.f32 %v1556_v27, 6.0 }
 0x4da   :  { %v1521_v32 = vadd.f32 3.0, %v1404_v19  ;;  %v1522_v51 = vadd.f32 3.0, %v1433_v42  ;;  %v1645_v46 = vmul.f32 0.16666667, %v1613_v1  ;;  %v1646_v58 = vmul.f32 0.16666667, %v1614_v24 }
 0x4db   :  { %v1619_v37 = vmul.f32 %v1587_v12, %v1462_v21  ;;  %v1620_v38 = vmul.f32 %v1588_v28, %v1491_v17 }
 0x4dc   :  { %v1553_v54 = vmax.f32 %v1521_v32, 0.0  ;;  %v1554_v0 = vmax.f32 %v1522_v51, 0.0 }
 0x4dd   :  { %v1651_v11 = vmul.f32 0.16666667, %v1619_v37  ;;  %v1652_v50 = vmul.f32 0.16666667, %v1620_v38 }
 0x4de   :  { %v1585_v33 = vmin.f32 %v1553_v54, 6.0  ;;  %v1586_v40 = vmin.f32 %v1554_v0, 6.0 }
 0x4df   :  { %v1667_v29 = vpack.c.bf16 %v1651_v11, %v1647_v39  ;;  %v1668_v55 = vpack.c.bf16 %v1652_v50, %v1648_v45  ;;  %v2050_v45 = vld [vmem:[#allocation8 + $0x28] sm:$0xff] }
 0x4e0   :  { %v1617_v41 = vmul.f32 %v1585_v33, %v1404_v19  ;;  %v1618_v44 = vmul.f32 %v1586_v40, %v1433_v42 }
 0x4e1   :  { %2010 = vmatmul.bf16.gmra.mxu0 %v1667_v29  ;;  %2039 = vmatmul.bf16.gmra.mxu1 %v1668_v55 }
 0x4e2   :  { %v1649_v48 = vmul.f32 0.16666667, %v1617_v41  ;;  %v1650_v53 = vmul.f32 0.16666667, %v1618_v44 }
 0x4e4   :  { %v1665_v5 = vpack.c.bf16 %v1649_v48, %v1645_v46  ;;  %v1666_v14 = vpack.c.bf16 %v1650_v53, %v1646_v58  ;;  %v2045_v48 = vld [vmem:[#allocation8] sm:$0xff]  ;;  %v2051_v53 = vld [vmem:[#allocation8 + $0x30] sm:$0xff] }
 0x4e6   :  { %1952 = vmatmul.bf16.gmra.mxu2 %v1665_v5  ;;  %1981 = vmatmul.bf16.gmra.mxu3 %v1666_v14 }
 0x4f1   :  { %2024 = vmatmul.bf16.vlgmr.msra.gmra.mxu0 %v1656_v59 }
 0x52e   :  { %v1996_v8 = vpop.f32.mrf.mxu0 }
 0x536   :  { %v3416_v60 = vpop.f32.mrf.mxu0 }
 0x539   :  { %v1938_v57 = vpop.f32.mrf.mxu2  ;;  %v1967_v26 = vpop.f32.mrf.mxu3 }
 0x53a   :  { %v1939_v39 = vadd.f32 %v3421_v36, %v1938_v57 }
 0x53c   :  { %v1968_v11 = vadd.f32 %v1967_v26, %v1939_v39 }
 0x53e   :  { %v2001_v62 = vpop.f32.mrf.mxu0  ;;  %v2030_v9 = vpop.f32.mrf.mxu1  ;;  %v1997_v44 = vadd.f32 %v1996_v8, %v1968_v11 }
 0x541   :  { %v1940_v22 = vpop.f32.mrf.mxu2  ;;  %v1969_v4 = vpop.f32.mrf.mxu3 }
 0x542   :  { %v1941_v55 = vadd.f32 %v3421_v36, %v1940_v22 }
 0x544   :  { %v1970_v57 = vadd.f32 %v1969_v4, %v1941_v55 }
 0x546   :  { %v2003_v63 = vpop.f32.mrf.mxu0  ;;  %v2032_v59 = vpop.f32.mrf.mxu1  ;;  %v1999_v22 = vadd.f32 %v3416_v60, %v1970_v57 }
 0x549   :  { %v1943_v3 = vpop.f32.mrf.mxu2  ;;  %v1972_v7 = vpop.f32.mrf.mxu3 }
 0x54a   :  { %v1944_v30 = vadd.f32 %v3421_v36, %v1943_v3 }
 0x54c   :  { %v1973_v15 = vadd.f32 %v1972_v7, %v1944_v30 }
 0x54e   :  { %v2002_v13 = vadd.f32 %v2001_v62, %v1973_v15  ;;  %v2006_v20 = vpop.f32.mrf.mxu0  ;;  %v2035_v23 = vpop.f32.mrf.mxu1  ;;  %v2046_v15 = vld [vmem:[#allocation8 + $0x8] sm:$0xff] }
 0x550   :  { %v2031_v21 = vadd.f32 %v2030_v9, %v2002_v13  ;;  %v2052_v13 = vld [vmem:[#allocation8 + $0x38] sm:$0xff] }
 0x551   :  { %v1945_v17 = vpop.f32.mrf.mxu2  ;;  %v1974_v61 = vpop.f32.mrf.mxu3 }
 0x552   :  { %v2055_v6 = vadd.f32 %v2047_v10, %v2031_v21  ;;  %v1946_v52 = vadd.f32 %v3421_v36, %v1945_v17 }
 0x554   :  { %2063 = vst [vmem:[#allocation19 + $0x10] sm:$0xff] %v2055_v6  ;;  %v1975_v56 = vadd.f32 %v1974_v61, %v1946_v52 }
 0x556   :  { %v2004_v47 = vadd.f32 %v2003_v63, %v1975_v56  ;;  %v2008_v31 = vpop.f32.mrf.mxu0  ;;  %v2037_v37 = vpop.f32.mrf.mxu1 }
 0x558   :  { %v2033_v2 = vadd.f32 %v2032_v59, %v2004_v47 }
 0x559   :  { %v1948_v27 = vpop.f32.mrf.mxu2  ;;  %v1977_v35 = vpop.f32.mrf.mxu3 }
 0x55a   :  { %v2056_v18 = vadd.f32 %v2048_v25, %v2033_v2  ;;  %v1949_v49 = vadd.f32 %v3421_v36, %v1948_v27 }
 0x55c   :  { %2064 = vst [vmem:[#allocation19 + $0x18] sm:$0xff] %v2056_v18  ;;  %v1978_v19 = vadd.f32 %v1977_v35, %v1949_v49 }
 0x55e   :  { %v2007_v42 = vadd.f32 %v2006_v20, %v1978_v19  ;;  %v2011_v43 = vpop.f32.mrf.mxu0  ;;  %v2040_v41 = vpop.f32.mrf.mxu1 }
 0x560   :  { %v2036_v12 = vadd.f32 %v2035_v23, %v2007_v42 }
 0x561   :  { %v1950_v28 = vpop.f32.mrf.mxu2  ;;  %v1979_v16 = vpop.f32.mrf.mxu3 }
 0x562   :  { %v2057_v32 = vadd.f32 %v2049_v34, %v2036_v12  ;;  %v1951_v51 = vadd.f32 %v3421_v36, %v1950_v28 }
 0x564   :  { %2065 = vst [vmem:[#allocation19 + $0x20] sm:$0xff] %v2057_v32  ;;  %v1980_v38 = vadd.f32 %v1979_v16, %v1951_v51 }
 0x566   :  { %v2009_v54 = vadd.f32 %v2008_v31, %v1980_v38  ;;  %v2013_v0 = vpop.f32.mrf.mxu0  ;;  %v2042_v59 = vpop.f32.mrf.mxu1 }
 0x568   :  { %v2038_v1 = vadd.f32 %v2037_v37, %v2009_v54 }
 0x569   :  { %v1953_v50 = vpop.f32.mrf.mxu2  ;;  %v1982_v24 = vpop.f32.mrf.mxu3 }
 0x56a   :  { %v2058_v33 = vadd.f32 %v2050_v45, %v2038_v1  ;;  %v1954_v40 = vadd.f32 %v3421_v36, %v1953_v50 }
 0x56c   :  { %2066 = vst [vmem:[#allocation19 + $0x28] sm:$0xff] %v2058_v33  ;;  %v1983_v29 = vadd.f32 %v1982_v24, %v1954_v40 }
 0x56e   :  { %v2012_v46 = vadd.f32 %v2011_v43, %v1983_v29  ;;  %v2025_v58 = vpop.f32.mrf.mxu0 }
 0x56f   :  { %v2026_v5 = vadd.f32 %v2025_v58, %v1997_v44 }
 0x570   :  { %v2041_v14 = vadd.f32 %v2040_v41, %v2012_v46 }
 0x571   :  { %v2053_v62 = vadd.f32 %v2045_v48, %v2026_v5  ;;  %v1955_v26 = vpop.f32.mrf.mxu2  ;;  %v1984_v3 = vpop.f32.mrf.mxu3 }
 0x572   :  { %v2059_v9 = vadd.f32 %v2051_v53, %v2041_v14  ;;  %v1956_v63 = vadd.f32 %v3421_v36, %v1955_v26 }
 0x573   :  { %2061 = vst [vmem:[#allocation19] sm:$0xff] %v2053_v62 }
 0x574   :  { %2067 = vst [vmem:[#allocation19 + $0x30] sm:$0xff] %v2059_v9  ;;  %v1985_v7 = vadd.f32 %v1984_v3, %v1956_v63 }
 0x576   :  { %v2014_v30 = vadd.f32 %v2013_v0, %v1985_v7  ;;  %v2027_v8 = vpop.f32.mrf.mxu0 }
 0x577   :  { %v2028_v20 = vadd.f32 %v2027_v8, %v1999_v22 }
 0x578   :  { %v2043_v4 = vadd.f32 %v2042_v59, %v2014_v30 }
 0x579   :  { %v2054_v36 = vadd.f32 %v2046_v15, %v2028_v20 }
 0x57a   :  { %v2060_v10 = vadd.f32 %v2052_v13, %v2043_v4 }
 0x57b   :  { %2062 = vst [vmem:[#allocation19 + $0x8] sm:$0xff] %v2054_v36 }
 0x57c   :  { %2068 = vst [vmem:[#allocation19 + $0x38] sm:$0xff] %v2060_v10 }
 0x57d   :  { %2081 = dma.vmem_to_hbm [thread:$0]  %s2074_s17, 1024, %s2076_s21, [#allocation4], %s2949_s27, %s2949_s27, %s2950_s28  }
 0x57e   :  { %2943 = dma.done.wait [#allocation4], 1024  }
 0x57f   :  { %2944 = vsyncadd [#allocation4], 4294966272 }
 0x580   :  { %2086 = vsyncpa [#allocation3], 1 }
 0x581   :  { %2087 = vsyncpa [#allocation6], 1 }
 0x582   :  { %2088 = vsyncpa [#allocation9], 1 }
 0x583   :  { %2089 = vsyncpa [#allocation12], 1 }
 0x584   :  { %2090 = vsyncpa [#allocation15], 1 }
 0x585   :  { %2091 = vsyncpa [#allocation18], 1 }
 0x586   :  { %2092 = vsyncpa [#allocation4], 1 }

</bundles_post_ra>
